<compile_context>
chip_gen: v6e
topology: v6e:2x2x1
jax: 0.10.0
libtpu: 0.0.40
codegen_flags: <defaults>
</compile_context>

<pallas_src>
import math
from functools import partial

import jax
import jax.numpy as jnp
from jax import lax
from jax.experimental import pallas as pl
from jax.experimental.pallas import tpu as pltpu

_VMEM_LIMIT = 32 * 1024 * 1024  # > v5e/v6e/v7x scoped defaults, < v7x physical


# ----------------------------- tiling helpers --------------------------------

def _round_up(n, m):
    return ((n + m - 1) // m) * m


def _aligned_divisor_tile(n, max_tile, align=16):
    """Largest t <= max_tile with t % align == 0 and n % t == 0.

    Callers guarantee n % align == 0, so a valid tile always exists."""
    t = min(max_tile, n)
    t -= t % align
    while t >= align:
        if n % t == 0:
            return t
        t -= align
    return n


def _feature_tile(f, max_tile=512):
    """Feature (lane) tile: multiple of 128 dividing f, or full f."""
    if f <= max_tile:
        return f
    t = (max_tile // 128) * 128
    while t >= 128:
        if f % t == 0:
            return t
        t -= 128
    return f


def _seq_tile(n):
    """Sequence tile (q and kv): multiple of 16, <= 256, minimizing padding."""
    if n <= 256:
        return _round_up(n, 16)
    best_t, best_pad = 256, _round_up(n, 256) - n
    for t in (192, 128):
        pad = _round_up(n, t) - n
        if pad < best_pad:
            best_t, best_pad = t, pad
    return best_t


def _proj_head_group(num_heads, head_dim, max_lanes=256):
    """Heads per QKV-projection grid step (matmul output width <= max_lanes)."""
    g = 1
    for cand in range(1, num_heads + 1):
        if num_heads % cand == 0 and cand * head_dim <= max_lanes:
            g = cand
    return g


def _flash_head_group(num_heads, head_dim):
    """Heads per flash grid step, such that the (B*N, C) output block is
    lane-legal: either hpb*head_dim % 128 == 0, or hpb == num_heads (full C)."""
    base = 128 // math.gcd(head_dim, 128)
    g = base
    while g < num_heads:
        if num_heads % g == 0:
            return g
        g += base
    return num_heads


# --------------------------- QKV projection kernel ---------------------------

def _qkv_proj_kernel(x_ref, w_ref, b_ref, q_ref, k_ref, v_ref, *,
                     heads_per_grp, head_dim):
    x = x_ref[...]                                        # (tm, C)
    outs = (q_ref, k_ref, v_ref)
    for j in range(3):                                    # q / k / v
        acc = jnp.dot(x, w_ref[j], preferred_element_type=jnp.float32)
        acc = acc + b_ref[j]                              # f32 bias, f32 acc
        y = acc.astype(q_ref.dtype)
        for h in range(heads_per_grp):                    # head split fused here
            outs[j][h] = y[:, h * head_dim:(h + 1) * head_dim]


def _qkv_projection(xf, w_prep, b_prep, *, num_heads, head_dim):
    m_rows, c_dim = xf.shape
    _, hg_count, _, grp_lanes = w_prep.shape
    grp = grp_lanes // head_dim
    tm = _aligned_divisor_tile(m_rows, 512, 16)

    out_sds = jax.ShapeDtypeStruct((num_heads, m_rows, head_dim), xf.dtype)
    out_spec = pl.BlockSpec((grp, tm, head_dim), lambda hg, mi: (hg, mi, 0))

    return pl.pallas_call(
        partial(_qkv_proj_kernel, heads_per_grp=grp, head_dim=head_dim),
        out_shape=(out_sds, out_sds, out_sds),
        grid=(hg_count, m_rows // tm),  # head-group outermost -> weight reuse
        in_specs=[
            pl.BlockSpec((tm, c_dim), lambda hg, mi: (mi, 0)),
            pl.BlockSpec((3, None, c_dim, grp_lanes),
                         lambda hg, mi: (0, hg, 0, 0)),
            pl.BlockSpec((3, None, 1, grp_lanes),
                         lambda hg, mi: (0, hg, 0, 0)),
        ],
        out_specs=(out_spec, out_spec, out_spec),
        compiler_params=pltpu.CompilerParams(
            dimension_semantics=("parallel", "parallel"),
            vmem_limit_bytes=_VMEM_LIMIT),
    )(xf, w_prep, b_prep)


# ------------------------- flash attention core kernel -----------------------

def _flash_kernel(q_ref, k_ref, v_ref, o_ref, m_sc, l_sc, acc_sc, *,
                  seq_len, kv_tile, heads_per_blk, head_dim, mask_padding):
    ki = pl.program_id(3)

    @pl.when(ki == 0)
    def _init():
        m_sc[...] = jnp.full(m_sc.shape, -jnp.inf, dtype=jnp.float32)
        l_sc[...] = jnp.zeros(l_sc.shape, dtype=jnp.float32)
        acc_sc[...] = jnp.zeros(acc_sc.shape, dtype=jnp.float32)

    q = q_ref[...]                                        # (hpb, tq, D)
    k = k_ref[...]                                        # (hpb, tk, D)

    # scores; 1/sqrt(D) scale already folded into the q weights/bias
    s = lax.dot_general(q, k, (((2,), (2,)), ((0,), (0,))),
                        preferred_element_type=jnp.float32)  # (hpb, tq, tk)

    if mask_padding:  # static flag: only present when the seq was padded
        kpos = ki * kv_tile + lax.broadcasted_iota(jnp.int32, s.shape, 2)
        s = jnp.where(kpos < seq_len, s, -1e30)

    m_prev = m_sc[...]
    m_new = jnp.maximum(m_prev, jnp.max(s, axis=-1, keepdims=True))
    alpha = jnp.exp(m_prev - m_new)
    # exp kept in f32 for portability (v5e EUP has no bf16 path)
    p = jnp.exp(s - m_new)
    p_mm = p.astype(v_ref.dtype)

    # Row-sum of p via a narrow MXU matmul (uses MXU slack instead of an XLU
    # cross-lane reduction; kernel is EUP/XLU bound at D=64).
    ones_rhs = jnp.ones((heads_per_blk, kv_tile, 8), dtype=p_mm.dtype)
    p_sum = lax.dot_general(p_mm, ones_rhs, (((2,), (1,)), ((0,), (0,))),
                            preferred_element_type=jnp.float32)[..., 0:1]

    l_sc[...] = alpha * l_sc[...] + p_sum
    acc_sc[...] = alpha * acc_sc[...] + lax.dot_general(
        p_mm, v_ref[...], (((2,), (1,)), ((0,), (0,))),
        preferred_element_type=jnp.float32)
    m_sc[...] = m_new

    @pl.when(ki == pl.num_programs(3) - 1)
    def _finish():
        # exact normalization; per-head slices written into the lane-dense
        # (tq, hpb*D) output block (heads already merged -> no XLA transpose).
        for h in range(heads_per_blk):
            o_ref[:, h * head_dim:(h + 1) * head_dim] = (
                acc_sc[h] / l_sc[h]).astype(o_ref.dtype)


def _flash_attention(q, k, v, *, batch, n_pad, seq_len, seq_tile, head_dim,
                     out_dtype):
    num_heads, m_rows, _ = q.shape
    c_dim = num_heads * head_dim
    hpb = _flash_head_group(num_heads, head_dim)
    n_tiles = n_pad // seq_tile

    def q_map(b, hg, qi, ki):
        return (hg, b * n_tiles + qi, 0)

    def kv_map(b, hg, qi, ki):
        return (hg, b * n_tiles + ki, 0)

    def o_map(b, hg, qi, ki):
        return (b * n_tiles + qi, hg)

    qkv_block = (hpb, seq_tile, head_dim)
    kernel = partial(_flash_kernel, seq_len=seq_len, kv_tile=seq_tile,
                     heads_per_blk=hpb, head_dim=head_dim,
                     mask_padding=(n_pad != seq_len))

    return pl.pallas_call(
        kernel,
        out_shape=jax.ShapeDtypeStruct((m_rows, c_dim), out_dtype),
        grid=(batch, num_heads // hpb, n_tiles, n_tiles),
        in_specs=[
            pl.BlockSpec(qkv_block, q_map),
            pl.BlockSpec(qkv_block, kv_map),
            pl.BlockSpec(qkv_block, kv_map),
        ],
        out_specs=pl.BlockSpec((seq_tile, hpb * head_dim), o_map),
        scratch_shapes=[
            pltpu.VMEM((hpb, seq_tile, 1), jnp.float32),         # running max
            pltpu.VMEM((hpb, seq_tile, 1), jnp.float32),         # running sum
            pltpu.VMEM((hpb, seq_tile, head_dim), jnp.float32),  # PV accum
        ],
        compiler_params=pltpu.CompilerParams(
            dimension_semantics=("parallel", "parallel", "parallel",
                                 "arbitrary"),
            vmem_limit_bytes=_VMEM_LIMIT),
    )(q, k, v)


# ------------------------------ output projection ----------------------------

def _linear_kernel(x_ref, w_ref, b_ref, o_ref):
    acc = jnp.dot(x_ref[...], w_ref[...], preferred_element_type=jnp.float32)
    o_ref[...] = (acc + b_ref[...]).astype(o_ref.dtype)


def _linear(x2d, w_t, b2, *, out_dtype):
    m_rows, k_dim = x2d.shape
    f_dim = w_t.shape[1]
    tm = _aligned_divisor_tile(m_rows, 1024, 16)
    tf = _feature_tile(f_dim, 512)
    return pl.pallas_call(
        _linear_kernel,
        out_shape=jax.ShapeDtypeStruct((m_rows, f_dim), out_dtype),
        grid=(f_dim // tf, m_rows // tm),   # feature axis outermost ->
        in_specs=[                          # weight block reused across rows
            pl.BlockSpec((tm, k_dim), lambda j, i: (i, 0)),
            pl.BlockSpec((k_dim, tf), lambda j, i: (0, j)),
            pl.BlockSpec((1, tf), lambda j, i: (0, j)),
        ],
        out_specs=pl.BlockSpec((tm, tf), lambda j, i: (i, j)),
        compiler_params=pltpu.CompilerParams(
            dimension_semantics=("parallel", "parallel"),
            vmem_limit_bytes=_VMEM_LIMIT),
    )(x2d, w_t, b2)


# ------------------------------ full forward pass -----------------------------

def prepare_attention_params(w_qkv, b_qkv, w_proj, b_proj, *, num_heads,
                             mxu_dtype=jnp.bfloat16):
    """One-time weight preparation (do this at model init, not per forward)."""
    c_dim = w_proj.shape[0]
    head_dim = c_dim // num_heads
    scale = head_dim ** (-0.5)
    grp = _proj_head_group(num_heads, head_dim)
    hg_count = num_heads // grp

    # Fold the q scale into the q columns of the (transposed) qkv weight/bias.
    scale_col = jnp.concatenate([
        jnp.full((c_dim,), scale, dtype=jnp.float32),
        jnp.ones((2 * c_dim,), dtype=jnp.float32)])
    w_t = jnp.transpose(w_qkv).astype(jnp.float32) * scale_col[None, :]  # (C,3C)
    b_s = b_qkv.astype(jnp.float32) * scale_col                          # (3C,)

    # Head-major layout so the projection kernel needs no in-kernel transpose.
    w_prep = (w_t.reshape(c_dim, 3, hg_count, grp * head_dim)
              .transpose(1, 2, 0, 3).astype(mxu_dtype))    # (3, HG, C, grp*D)
    b_prep = b_s.reshape(3, hg_count, 1, grp * head_dim)   # keep f32

    w_proj_t = jnp.transpose(w_proj).astype(mxu_dtype)     # (C, C)
    b_proj2 = b_proj.astype(jnp.float32).reshape(1, c_dim)
    return w_prep, b_prep, w_proj_t, b_proj2


@partial(jax.jit, static_argnames=("num_heads",))
def attention_forward(x, w_prep, b_prep, w_proj_t, b_proj2, *, num_heads):
    """x: (B, N, C); prepared params from prepare_attention_params."""
    batch, seq_len, c_dim = x.shape
    assert c_dim % num_heads == 0
    head_dim = c_dim // num_heads
    out_dtype = x.dtype
    mxu_dtype = w_prep.dtype

    tseq = _seq_tile(seq_len)
    n_pad = _round_up(seq_len, tseq)
    if n_pad != seq_len:
        x = jnp.pad(x, ((0, 0), (0, n_pad - seq_len), (0, 0)))
    m_rows = batch * n_pad
    xf = x.reshape(m_rows, c_dim).astype(mxu_dtype)

    # qkv projection -> q/k/v in (H, B*N_pad, D) layout, no XLA transpose
    q, k, v = _qkv_projection(xf, w_prep, b_prep,
                              num_heads=num_heads, head_dim=head_dim)

    # flash attention core -> (B*N_pad, C) directly, no XLA head-merge
    attn = _flash_attention(q, k, v, batch=batch, n_pad=n_pad,
                            seq_len=seq_len, seq_tile=tseq,
                            head_dim=head_dim, out_dtype=mxu_dtype)

    # output projection
    out = _linear(attn, w_proj_t, b_proj2, out_dtype=out_dtype)
    out = out.reshape(batch, n_pad, c_dim)
    if n_pad != seq_len:
        out = out[:, :seq_len, :]
    return out


# --------------------------------- reference ---------------------------------

def attention_ref(x, w_qkv, b_qkv, w_proj, b_proj, *, num_heads):
    """Plain-JAX reference mirroring the PyTorch forward (naive path)."""
    B, N, C = x.shape
    D = C // num_heads
    scale = D ** (-0.5)
    qkv = x @ w_qkv.T + b_qkv                                   # (B, N, 3C)
    qkv = qkv.reshape(B, N, 3, num_heads, D).transpose(2, 0, 3, 1, 4)
    q, k, v = qkv[0], qkv[1], qkv[2]                            # (B, H, N, D)
    attn = jax.nn.softmax((q * scale) @ jnp.swapaxes(k, -2, -1), axis=-1)
    out = (attn @ v).transpose(0, 2, 1, 3).reshape(B, N, C)
    return out @ w_proj.T + b_proj


if __name__ == "__main__":
    # Small shapes consistent with the module: dim=32, num_heads=4, H=W=4 -> N=16
    B, Hs, Ws = 2, 4, 4
    N = Hs * Ws
    C = 32
    num_heads = 4

    key = jax.random.PRNGKey(0)
    kx, k1, k2, k3, k4 = jax.random.split(key, 5)
    x = jax.random.normal(kx, (B, N, C), dtype=jnp.float32)
    w_qkv = jax.random.normal(k1, (3 * C, C), dtype=jnp.float32) * 0.05
    b_qkv = jax.random.normal(k2, (3 * C,), dtype=jnp.float32) * 0.05
    w_proj = jax.random.normal(k3, (C, C), dtype=jnp.float32) * 0.05
    b_proj = jax.random.normal(k4, (C,), dtype=jnp.float32) * 0.05

    ref = attention_ref(x, w_qkv, b_qkv, w_proj, b_proj, num_heads=num_heads)

    # Exact-precision path: f32 MXU operands (tight tolerance).
    p32 = prepare_attention_params(w_qkv, b_qkv, w_proj, b_proj,
                                   num_heads=num_heads, mxu_dtype=jnp.float32)
    out32 = jax.block_until_ready(
        attention_forward(x, *p32, num_heads=num_heads))
    assert out32.shape == (B, N, C)
    err32 = float(jnp.max(jnp.abs(out32 - ref)))
    assert jnp.allclose(out32, ref, atol=2e-3, rtol=2e-3), f"f32 err={err32}"

    # Fast default path: bf16 MXU operands, f32 accumulation / softmax stats.
    pbf = prepare_attention_params(w_qkv, b_qkv, w_proj, b_proj,
                                   num_heads=num_heads, mxu_dtype=jnp.bfloat16)
    outbf = jax.block_until_ready(
        attention_forward(x, *pbf, num_heads=num_heads))
    assert outbf.shape == (B, N, C)
    outbf32 = outbf.astype(jnp.float32)
    errbf = float(jnp.max(jnp.abs(outbf32 - ref)))
    assert jnp.allclose(outbf32, ref, atol=1e-2, rtol=5e-2), f"bf16 err={errbf}"

    print("KERNEL_OK")
</pallas_src>

<mosaic_0001>
module attributes {stable_mosaic.version = 11 : i64} {
  func.func @_linear_kernel(%arg0: i32, %arg1: i32, %arg2: memref<32x32xf32, #tpu.memory_space<vmem>>, %arg3: memref<32x32xf32, #tpu.memory_space<vmem>>, %arg4: memref<1x32xf32, #tpu.memory_space<vmem>>, %arg5: memref<32x32xf32, #tpu.memory_space<vmem>>) attributes {dimension_semantics = [#tpu.dimension_semantics<parallel>, #tpu.dimension_semantics<parallel>], iteration_bounds = array<i64: 1, 1>, scalar_prefetch = 0 : i64, scratch_operands = 0 : i64, tpu.core_type = #tpu.core_type<tc>, window_params = [{transform_indices = @transform_0, window_bounds = array<i64: 32, 32>}, {transform_indices = @transform_1, window_bounds = array<i64: 32, 32>}, {transform_indices = @transform_2, window_bounds = array<i64: 1, 32>}, {transform_indices = @transform_3, window_bounds = array<i64: 32, 32>}]} {
    %c0 = arith.constant 0 : index
    %c0_0 = arith.constant 0 : index
    %0 = vector.load %arg2[%c0, %c0_0] : memref<32x32xf32, #tpu.memory_space<vmem>>, vector<32x32xf32>
    %c0_1 = arith.constant 0 : index
    %c0_2 = arith.constant 0 : index
    %1 = vector.load %arg3[%c0_1, %c0_2] : memref<32x32xf32, #tpu.memory_space<vmem>>, vector<32x32xf32>
    %cst = arith.constant dense<0.000000e+00> : vector<32x32xf32>
    %2 = tpu.matmul %0, %1, %cst {dimension_numbers = #tpu.dot_dimension_numbers<[1], [0], [0], [1], [0, 0, 1, 1], [], []>} : vector<32x32xf32>, vector<32x32xf32>, vector<32x32xf32> -> vector<32x32xf32>
    %c0_3 = arith.constant 0 : index
    %c0_4 = arith.constant 0 : index
    %3 = vector.load %arg4[%c0_3, %c0_4] : memref<1x32xf32, #tpu.memory_space<vmem>>, vector<1x32xf32>
    %4 = vector.broadcast %3 : vector<1x32xf32> to vector<32x32xf32>
    %5 = arith.addf %2, %4 : vector<32x32xf32>
    %c0_5 = arith.constant 0 : index
    %c0_6 = arith.constant 0 : index
    %6 = vector.load %arg5[%c0_5, %c0_6] : memref<32x32xf32, #tpu.memory_space<vmem>>, vector<32x32xf32>
    tpu.vector_store %arg5[%c0_5, %c0_6], %5 {strides = array<i32>} : memref<32x32xf32, #tpu.memory_space<vmem>>, vector<32x32xf32>,
    return
  }
  func.func @transform_0(%arg0: i32, %arg1: i32) -> (i32, i32) {
    %c0_i32 = arith.constant 0 : i32
    %c0_i32_0 = arith.constant 0 : i32
    return %arg1, %c0_i32 : i32, i32
  }
  func.func @transform_1(%arg0: i32, %arg1: i32) -> (i32, i32) {
    %c0_i32 = arith.constant 0 : i32
    %c0_i32_0 = arith.constant 0 : i32
    return %c0_i32, %arg0 : i32, i32
  }
  func.func @transform_2(%arg0: i32, %arg1: i32) -> (i32, i32) {
    %c0_i32 = arith.constant 0 : i32
    %c0_i32_0 = arith.constant 0 : i32
    return %c0_i32, %arg0 : i32, i32
  }
  func.func @transform_3(%arg0: i32, %arg1: i32) -> (i32, i32) {
    %c0_i32 = arith.constant 0 : i32
    return %arg1, %arg0 : i32, i32
  }
}

module attributes {stable_mosaic.version = 11 : i64} {
  func.func @_qkv_proj_kernel(%arg0: i32, %arg1: i32, %arg2: memref<32x32xf32, #tpu.memory_space<vmem>>, %arg3: memref<3x1x32x32xf32, #tpu.memory_space<vmem>>, %arg4: memref<3x1x1x32xf32, #tpu.memory_space<vmem>>, %arg5: memref<4x32x8xf32, #tpu.memory_space<vmem>>, %arg6: memref<4x32x8xf32, #tpu.memory_space<vmem>>, %arg7: memref<4x32x8xf32, #tpu.memory_space<vmem>>) attributes {dimension_semantics = [#tpu.dimension_semantics<parallel>, #tpu.dimension_semantics<parallel>], iteration_bounds = array<i64: 1, 1>, scalar_prefetch = 0 : i64, scratch_operands = 0 : i64, tpu.core_type = #tpu.core_type<tc>, window_params = [{transform_indices = @transform_0, window_bounds = array<i64: 32, 32>}, {transform_indices = @transform_1, window_bounds = array<i64: 3, 1, 32, 32>}, {transform_indices = @transform_2, window_bounds = array<i64: 3, 1, 1, 32>}, {transform_indices = @transform_3, window_bounds = array<i64: 4, 32, 8>}, {transform_indices = @transform_4, window_bounds = array<i64: 4, 32, 8>}, {transform_indices = @transform_5, window_bounds = array<i64: 4, 32, 8>}]} {
    %c0 = arith.constant 0 : index
    %c0_0 = arith.constant 0 : index
    %0 = vector.load %arg2[%c0, %c0_0] : memref<32x32xf32, #tpu.memory_space<vmem>>, vector<32x32xf32>
    %c0_1 = arith.constant 0 : index
    %c0_2 = arith.constant 0 : index
    %c0_3 = arith.constant 0 : index
    %c0_4 = arith.constant 0 : index
    %1 = vector.load %arg3[%c0_1, %c0_2, %c0_3, %c0_4] : memref<3x1x32x32xf32, #tpu.memory_space<vmem>>, vector<1x1x32x32xf32>
    %2 = vector.shape_cast %1 : vector<1x1x32x32xf32> to vector<32x32xf32>
    %cst = arith.constant dense<0.000000e+00> : vector<32x32xf32>
    %3 = tpu.matmul %0, %2, %cst {dimension_numbers = #tpu.dot_dimension_numbers<[1], [0], [0], [1], [0, 0, 1, 1], [], []>} : vector<32x32xf32>, vector<32x32xf32>, vector<32x32xf32> -> vector<32x32xf32>
    %c0_5 = arith.constant 0 : index
    %c0_6 = arith.constant 0 : index
    %c0_7 = arith.constant 0 : index
    %c0_8 = arith.constant 0 : index
    %4 = vector.load %arg4[%c0_5, %c0_6, %c0_7, %c0_8] : memref<3x1x1x32xf32, #tpu.memory_space<vmem>>, vector<1x1x1x32xf32>
    %5 = vector.shape_cast %4 : vector<1x1x1x32xf32> to vector<1x32xf32>
    %6 = vector.broadcast %5 : vector<1x32xf32> to vector<32x32xf32>
    %7 = arith.addf %3, %6 : vector<32x32xf32>
    %8 = vector.extract_strided_slice %7 {offsets = [0, 0], sizes = [32, 8], strides = [1, 1]} : vector<32x32xf32> to vector<32x8xf32>
    %c0_9 = arith.constant 0 : index
    %c0_10 = arith.constant 0 : index
    %c0_11 = arith.constant 0 : index
    %9 = vector.load %arg5[%c0_9, %c0_10, %c0_11] : memref<4x32x8xf32, #tpu.memory_space<vmem>>, vector<1x32x8xf32>
    %10 = vector.shape_cast %9 : vector<1x32x8xf32> to vector<32x8xf32>
    %11 = vector.shape_cast %8 : vector<32x8xf32> to vector<1x32x8xf32>
    tpu.vector_store %arg5[%c0_9, %c0_10, %c0_11], %11 {strides = array<i32>} : memref<4x32x8xf32, #tpu.memory_space<vmem>>, vector<1x32x8xf32>,
    %12 = vector.extract_strided_slice %7 {offsets = [0, 8], sizes = [32, 8], strides = [1, 1]} : vector<32x32xf32> to vector<32x8xf32>
    %c1 = arith.constant 1 : index
    %c0_12 = arith.constant 0 : index
    %c0_13 = arith.constant 0 : index
    %13 = vector.load %arg5[%c1, %c0_12, %c0_13] : memref<4x32x8xf32, #tpu.memory_space<vmem>>, vector<1x32x8xf32>
    %14 = vector.shape_cast %13 : vector<1x32x8xf32> to vector<32x8xf32>
    %15 = vector.shape_cast %12 : vector<32x8xf32> to vector<1x32x8xf32>
    tpu.vector_store %arg5[%c1, %c0_12, %c0_13], %15 {strides = array<i32>} : memref<4x32x8xf32, #tpu.memory_space<vmem>>, vector<1x32x8xf32>,
    %16 = vector.extract_strided_slice %7 {offsets = [0, 16], sizes = [32, 8], strides = [1, 1]} : vector<32x32xf32> to vector<32x8xf32>
    %c2 = arith.constant 2 : index
    %c0_14 = arith.constant 0 : index
    %c0_15 = arith.constant 0 : index
    %17 = vector.load %arg5[%c2, %c0_14, %c0_15] : memref<4x32x8xf32, #tpu.memory_space<vmem>>, vector<1x32x8xf32>
    %18 = vector.shape_cast %17 : vector<1x32x8xf32> to vector<32x8xf32>
    %19 = vector.shape_cast %16 : vector<32x8xf32> to vector<1x32x8xf32>
    tpu.vector_store %arg5[%c2, %c0_14, %c0_15], %19 {strides = array<i32>} : memref<4x32x8xf32, #tpu.memory_space<vmem>>, vector<1x32x8xf32>,
    %20 = vector.extract_strided_slice %7 {offsets = [0, 24], sizes = [32, 8], strides = [1, 1]} : vector<32x32xf32> to vector<32x8xf32>
    %c3 = arith.constant 3 : index
    %c0_16 = arith.constant 0 : index
    %c0_17 = arith.constant 0 : index
    %21 = vector.load %arg5[%c3, %c0_16, %c0_17] : memref<4x32x8xf32, #tpu.memory_space<vmem>>, vector<1x32x8xf32>
    %22 = vector.shape_cast %21 : vector<1x32x8xf32> to vector<32x8xf32>
    %23 = vector.shape_cast %20 : vector<32x8xf32> to vector<1x32x8xf32>
    tpu.vector_store %arg5[%c3, %c0_16, %c0_17], %23 {strides = array<i32>} : memref<4x32x8xf32, #tpu.memory_space<vmem>>, vector<1x32x8xf32>,
    %c1_18 = arith.constant 1 : index
    %c0_19 = arith.constant 0 : index
    %c0_20 = arith.constant 0 : index
    %c0_21 = arith.constant 0 : index
    %24 = vector.load %arg3[%c1_18, %c0_19, %c0_20, %c0_21] : memref<3x1x32x32xf32, #tpu.memory_space<vmem>>, vector<1x1x32x32xf32>
    %25 = vector.shape_cast %24 : vector<1x1x32x32xf32> to vector<32x32xf32>
    %cst_22 = arith.constant dense<0.000000e+00> : vector<32x32xf32>
    %26 = tpu.matmul %0, %25, %cst_22 {dimension_numbers = #tpu.dot_dimension_numbers<[1], [0], [0], [1], [0, 0, 1, 1], [], []>} : vector<32x32xf32>, vector<32x32xf32>, vector<32x32xf32> -> vector<32x32xf32>
    %c1_23 = arith.constant 1 : index
    %c0_24 = arith.constant 0 : index
    %c0_25 = arith.constant 0 : index
    %c0_26 = arith.constant 0 : index
    %27 = vector.load %arg4[%c1_23, %c0_24, %c0_25, %c0_26] : memref<3x1x1x32xf32, #tpu.memory_space<vmem>>, vector<1x1x1x32xf32>
    %28 = vector.shape_cast %27 : vector<1x1x1x32xf32> to vector<1x32xf32>
    %29 = vector.broadcast %28 : vector<1x32xf32> to vector<32x32xf32>
    %30 = arith.addf %26, %29 : vector<32x32xf32>
    %31 = vector.extract_strided_slice %30 {offsets = [0, 0], sizes = [32, 8], strides = [1, 1]} : vector<32x32xf32> to vector<32x8xf32>
    %c0_27 = arith.constant 0 : index
    %c0_28 = arith.constant 0 : index
    %c0_29 = arith.constant 0 : index
    %32 = vector.load %arg6[%c0_27, %c0_28, %c0_29] : memref<4x32x8xf32, #tpu.memory_space<vmem>>, vector<1x32x8xf32>
    %33 = vector.shape_cast %32 : vector<1x32x8xf32> to vector<32x8xf32>
    %34 = vector.shape_cast %31 : vector<32x8xf32> to vector<1x32x8xf32>
    tpu.vector_store %arg6[%c0_27, %c0_28, %c0_29], %34 {strides = array<i32>} : memref<4x32x8xf32, #tpu.memory_space<vmem>>, vector<1x32x8xf32>,
    %35 = vector.extract_strided_slice %30 {offsets = [0, 8], sizes = [32, 8], strides = [1, 1]} : vector<32x32xf32> to vector<32x8xf32>
    %c1_30 = arith.constant 1 : index
    %c0_31 = arith.constant 0 : index
    %c0_32 = arith.constant 0 : index
    %36 = vector.load %arg6[%c1_30, %c0_31, %c0_32] : memref<4x32x8xf32, #tpu.memory_space<vmem>>, vector<1x32x8xf32>
    %37 = vector.shape_cast %36 : vector<1x32x8xf32> to vector<32x8xf32>
    %38 = vector.shape_cast %35 : vector<32x8xf32> to vector<1x32x8xf32>
    tpu.vector_store %arg6[%c1_30, %c0_31, %c0_32], %38 {strides = array<i32>} : memref<4x32x8xf32, #tpu.memory_space<vmem>>, vector<1x32x8xf32>,
    %39 = vector.extract_strided_slice %30 {offsets = [0, 16], sizes = [32, 8], strides = [1, 1]} : vector<32x32xf32> to vector<32x8xf32>
    %c2_33 = arith.constant 2 : index
    %c0_34 = arith.constant 0 : index
    %c0_35 = arith.constant 0 : index
    %40 = vector.load %arg6[%c2_33, %c0_34, %c0_35] : memref<4x32x8xf32, #tpu.memory_space<vmem>>, vector<1x32x8xf32>
    %41 = vector.shape_cast %40 : vector<1x32x8xf32> to vector<32x8xf32>
    %42 = vector.shape_cast %39 : vector<32x8xf32> to vector<1x32x8xf32>
    tpu.vector_store %arg6[%c2_33, %c0_34, %c0_35], %42 {strides = array<i32>} : memref<4x32x8xf32, #tpu.memory_space<vmem>>, vector<1x32x8xf32>,
    %43 = vector.extract_strided_slice %30 {offsets = [0, 24], sizes = [32, 8], strides = [1, 1]} : vector<32x32xf32> to vector<32x8xf32>
    %c3_36 = arith.constant 3 : index
    %c0_37 = arith.constant 0 : index
    %c0_38 = arith.constant 0 : index
    %44 = vector.load %arg6[%c3_36, %c0_37, %c0_38] : memref<4x32x8xf32, #tpu.memory_space<vmem>>, vector<1x32x8xf32>
    %45 = vector.shape_cast %44 : vector<1x32x8xf32> to vector<32x8xf32>
    %46 = vector.shape_cast %43 : vector<32x8xf32> to vector<1x32x8xf32>
    tpu.vector_store %arg6[%c3_36, %c0_37, %c0_38], %46 {strides = array<i32>} : memref<4x32x8xf32, #tpu.memory_space<vmem>>, vector<1x32x8xf32>,
    %c2_39 = arith.constant 2 : index
    %c0_40 = arith.constant 0 : index
    %c0_41 = arith.constant 0 : index
    %c0_42 = arith.constant 0 : index
    %47 = vector.load %arg3[%c2_39, %c0_40, %c0_41, %c0_42] : memref<3x1x32x32xf32, #tpu.memory_space<vmem>>, vector<1x1x32x32xf32>
    %48 = vector.shape_cast %47 : vector<1x1x32x32xf32> to vector<32x32xf32>
    %cst_43 = arith.constant dense<0.000000e+00> : vector<32x32xf32>
    %49 = tpu.matmul %0, %48, %cst_43 {dimension_numbers = #tpu.dot_dimension_numbers<[1], [0], [0], [1], [0, 0, 1, 1], [], []>} : vector<32x32xf32>, vector<32x32xf32>, vector<32x32xf32> -> vector<32x32xf32>
    %c2_44 = arith.constant 2 : index
    %c0_45 = arith.constant 0 : index
    %c0_46 = arith.constant 0 : index
    %c0_47 = arith.constant 0 : index
    %50 = vector.load %arg4[%c2_44, %c0_45, %c0_46, %c0_47] : memref<3x1x1x32xf32, #tpu.memory_space<vmem>>, vector<1x1x1x32xf32>
    %51 = vector.shape_cast %50 : vector<1x1x1x32xf32> to vector<1x32xf32>
    %52 = vector.broadcast %51 : vector<1x32xf32> to vector<32x32xf32>
    %53 = arith.addf %49, %52 : vector<32x32xf32>
    %54 = vector.extract_strided_slice %53 {offsets = [0, 0], sizes = [32, 8], strides = [1, 1]} : vector<32x32xf32> to vector<32x8xf32>
    %c0_48 = arith.constant 0 : index
    %c0_49 = arith.constant 0 : index
    %c0_50 = arith.constant 0 : index
    %55 = vector.load %arg7[%c0_48, %c0_49, %c0_50] : memref<4x32x8xf32, #tpu.memory_space<vmem>>, vector<1x32x8xf32>
    %56 = vector.shape_cast %55 : vector<1x32x8xf32> to vector<32x8xf32>
    %57 = vector.shape_cast %54 : vector<32x8xf32> to vector<1x32x8xf32>
    tpu.vector_store %arg7[%c0_48, %c0_49, %c0_50], %57 {strides = array<i32>} : memref<4x32x8xf32, #tpu.memory_space<vmem>>, vector<1x32x8xf32>,
    %58 = vector.extract_strided_slice %53 {offsets = [0, 8], sizes = [32, 8], strides = [1, 1]} : vector<32x32xf32> to vector<32x8xf32>
    %c1_51 = arith.constant 1 : index
    %c0_52 = arith.constant 0 : index
    %c0_53 = arith.constant 0 : index
    %59 = vector.load %arg7[%c1_51, %c0_52, %c0_53] : memref<4x32x8xf32, #tpu.memory_space<vmem>>, vector<1x32x8xf32>
    %60 = vector.shape_cast %59 : vector<1x32x8xf32> to vector<32x8xf32>
    %61 = vector.shape_cast %58 : vector<32x8xf32> to vector<1x32x8xf32>
    tpu.vector_store %arg7[%c1_51, %c0_52, %c0_53], %61 {strides = array<i32>} : memref<4x32x8xf32, #tpu.memory_space<vmem>>, vector<1x32x8xf32>,
    %62 = vector.extract_strided_slice %53 {offsets = [0, 16], sizes = [32, 8], strides = [1, 1]} : vector<32x32xf32> to vector<32x8xf32>
    %c2_54 = arith.constant 2 : index
    %c0_55 = arith.constant 0 : index
    %c0_56 = arith.constant 0 : index
    %63 = vector.load %arg7[%c2_54, %c0_55, %c0_56] : memref<4x32x8xf32, #tpu.memory_space<vmem>>, vector<1x32x8xf32>
    %64 = vector.shape_cast %63 : vector<1x32x8xf32> to vector<32x8xf32>
    %65 = vector.shape_cast %62 : vector<32x8xf32> to vector<1x32x8xf32>
    tpu.vector_store %arg7[%c2_54, %c0_55, %c0_56], %65 {strides = array<i32>} : memref<4x32x8xf32, #tpu.memory_space<vmem>>, vector<1x32x8xf32>,
    %66 = vector.extract_strided_slice %53 {offsets = [0, 24], sizes = [32, 8], strides = [1, 1]} : vector<32x32xf32> to vector<32x8xf32>
    %c3_57 = arith.constant 3 : index
    %c0_58 = arith.constant 0 : index
    %c0_59 = arith.constant 0 : index
    %67 = vector.load %arg7[%c3_57, %c0_58, %c0_59] : memref<4x32x8xf32, #tpu.memory_space<vmem>>, vector<1x32x8xf32>
    %68 = vector.shape_cast %67 : vector<1x32x8xf32> to vector<32x8xf32>
    %69 = vector.shape_cast %66 : vector<32x8xf32> to vector<1x32x8xf32>
    tpu.vector_store %arg7[%c3_57, %c0_58, %c0_59], %69 {strides = array<i32>} : memref<4x32x8xf32, #tpu.memory_space<vmem>>, vector<1x32x8xf32>,
    return
  }
  func.func @transform_0(%arg0: i32, %arg1: i32) -> (i32, i32) {
    %c0_i32 = arith.constant 0 : i32
    %c0_i32_0 = arith.constant 0 : i32
    return %arg1, %c0_i32 : i32, i32
  }
  func.func @transform_1(%arg0: i32, %arg1: i32) -> (i32, i32, i32, i32) {
    %c0_i32 = arith.constant 0 : i32
    %c0_i32_0 = arith.constant 0 : i32
    %c0_i32_1 = arith.constant 0 : i32
    %c0_i32_2 = arith.constant 0 : i32
    return %c0_i32, %arg0, %c0_i32_0, %c0_i32_1 : i32, i32, i32, i32
  }
  func.func @transform_2(%arg0: i32, %arg1: i32) -> (i32, i32, i32, i32) {
    %c0_i32 = arith.constant 0 : i32
    %c0_i32_0 = arith.constant 0 : i32
    %c0_i32_1 = arith.constant 0 : i32
    %c0_i32_2 = arith.constant 0 : i32
    return %c0_i32, %arg0, %c0_i32_0, %c0_i32_1 : i32, i32, i32, i32
  }
  func.func @transform_3(%arg0: i32, %arg1: i32) -> (i32, i32, i32) {
    %c0_i32 = arith.constant 0 : i32
    %c0_i32_0 = arith.constant 0 : i32
    return %arg0, %arg1, %c0_i32 : i32, i32, i32
  }
  func.func @transform_4(%arg0: i32, %arg1: i32) -> (i32, i32, i32) {
    %c0_i32 = arith.constant 0 : i32
    %c0_i32_0 = arith.constant 0 : i32
    return %arg0, %arg1, %c0_i32 : i32, i32, i32
  }
  func.func @transform_5(%arg0: i32, %arg1: i32) -> (i32, i32, i32) {
    %c0_i32 = arith.constant 0 : i32
    %c0_i32_0 = arith.constant 0 : i32
    return %arg0, %arg1, %c0_i32 : i32, i32, i32
  }
}

module attributes {stable_mosaic.version = 11 : i64} {
  func.func @_flash_kernel(%arg0: i32, %arg1: i32, %arg2: i32, %arg3: i32, %arg4: memref<4x16x8xf32, #tpu.memory_space<vmem>>, %arg5: memref<4x16x8xf32, #tpu.memory_space<vmem>>, %arg6: memref<4x16x8xf32, #tpu.memory_space<vmem>>, %arg7: memref<16x32xf32, #tpu.memory_space<vmem>>, %arg8: memref<4x16x1xf32, #tpu.memory_space<vmem>>, %arg9: memref<4x16x1xf32, #tpu.memory_space<vmem>>, %arg10: memref<4x16x8xf32, #tpu.memory_space<vmem>>) attributes {dimension_semantics = [#tpu.dimension_semantics<parallel>, #tpu.dimension_semantics<parallel>, #tpu.dimension_semantics<parallel>, #tpu.dimension_semantics<arbitrary>], iteration_bounds = array<i64: 2, 1, 1, 1>, scalar_prefetch = 0 : i64, scratch_operands = 3 : i64, tpu.core_type = #tpu.core_type<tc>, window_params = [{transform_indices = @transform_0, window_bounds = array<i64: 4, 16, 8>}, {transform_indices = @transform_1, window_bounds = array<i64: 4, 16, 8>}, {transform_indices = @transform_2, window_bounds = array<i64: 4, 16, 8>}, {transform_indices = @transform_3, window_bounds = array<i64: 16, 32>}]} {
    %c0_i32 = arith.constant 0 : i32
    %0 = arith.cmpi eq, %arg3, %c0_i32 : i32
    %1 = arith.extui %0 : i1 to i32
    %c0_i32_0 = arith.constant 0 : i32
    %2 = arith.cmpi ne, %1, %c0_i32_0 : i32
    scf.if %2 {
      %cst_33 = arith.constant 0xFF800000 : f32
      %33 = vector.broadcast %cst_33 : f32 to vector<4x16x1xf32>
      %c0_34 = arith.constant 0 : index
      %c0_35 = arith.constant 0 : index
      %c0_36 = arith.constant 0 : index
      %34 = vector.load %arg8[%c0_34, %c0_35, %c0_36] : memref<4x16x1xf32, #tpu.memory_space<vmem>>, vector<4x16x1xf32>
      tpu.vector_store %arg8[%c0_34, %c0_35, %c0_36], %33 {strides = array<i32>} : memref<4x16x1xf32, #tpu.memory_space<vmem>>, vector<4x16x1xf32>,
      %cst_37 = arith.constant 0.000000e+00 : f32
      %35 = vector.broadcast %cst_37 : f32 to vector<4x16x1xf32>
      %c0_38 = arith.constant 0 : index
      %c0_39 = arith.constant 0 : index
      %c0_40 = arith.constant 0 : index
      %36 = vector.load %arg9[%c0_38, %c0_39, %c0_40] : memref<4x16x1xf32, #tpu.memory_space<vmem>>, vector<4x16x1xf32>
      tpu.vector_store %arg9[%c0_38, %c0_39, %c0_40], %35 {strides = array<i32>} : memref<4x16x1xf32, #tpu.memory_space<vmem>>, vector<4x16x1xf32>,
      %cst_41 = arith.constant 0.000000e+00 : f32
      %37 = vector.broadcast %cst_41 : f32 to vector<4x16x8xf32>
      %c0_42 = arith.constant 0 : index
      %c0_43 = arith.constant 0 : index
      %c0_44 = arith.constant 0 : index
      %38 = vector.load %arg10[%c0_42, %c0_43, %c0_44] : memref<4x16x8xf32, #tpu.memory_space<vmem>>, vector<4x16x8xf32>
      tpu.vector_store %arg10[%c0_42, %c0_43, %c0_44], %37 {strides = array<i32>} : memref<4x16x8xf32, #tpu.memory_space<vmem>>, vector<4x16x8xf32>,
    } else {
    }
    %c0 = arith.constant 0 : index
    %c0_1 = arith.constant 0 : index
    %c0_2 = arith.constant 0 : index
    %3 = vector.load %arg4[%c0, %c0_1, %c0_2] : memref<4x16x8xf32, #tpu.memory_space<vmem>>, vector<4x16x8xf32>
    %c0_3 = arith.constant 0 : index
    %c0_4 = arith.constant 0 : index
    %c0_5 = arith.constant 0 : index
    %4 = vector.load %arg5[%c0_3, %c0_4, %c0_5] : memref<4x16x8xf32, #tpu.memory_space<vmem>>, vector<4x16x8xf32>
    %cst = arith.constant dense<0.000000e+00> : vector<4x16x16xf32>
    %5 = tpu.matmul %3, %4, %cst {dimension_numbers = #tpu.dot_dimension_numbers<[2], [2], [1], [1], [0, 0, 0, 1, 1, 1], [0], [0]>} : vector<4x16x8xf32>, vector<4x16x8xf32>, vector<4x16x16xf32> -> vector<4x16x16xf32>
    %c0_6 = arith.constant 0 : index
    %c0_7 = arith.constant 0 : index
    %c0_8 = arith.constant 0 : index
    %6 = vector.load %arg8[%c0_6, %c0_7, %c0_8] : memref<4x16x1xf32, #tpu.memory_space<vmem>>, vector<4x16x1xf32>
    %cst_9 = arith.constant dense<0xFF800000> : vector<4x16xf32>
    %7 = vector.multi_reduction <maximumf>, %5, %cst_9 [2] : vector<4x16x16xf32> to vector<4x16xf32>
    %8 = vector.shape_cast %7 : vector<4x16xf32> to vector<4x16x1xf32>
    %9 = arith.maximumf %6, %8 : vector<4x16x1xf32>
    %10 = arith.subf %6, %9 : vector<4x16x1xf32>
    %11 = math.exp %10 : vector<4x16x1xf32>
    %12 = vector.broadcast %9 : vector<4x16x1xf32> to vector<4x16x16xf32>
    %13 = arith.subf %5, %12 : vector<4x16x16xf32>
    %14 = math.exp %13 : vector<4x16x16xf32>
    %cst_10 = arith.constant 1.000000e+00 : f32
    %15 = vector.broadcast %cst_10 : f32 to vector<4x16x8xf32>
    %cst_11 = arith.constant dense<0.000000e+00> : vector<4x16x8xf32>
    %16 = tpu.matmul %14, %15, %cst_11 {dimension_numbers = #tpu.dot_dimension_numbers<[2], [1], [1], [2], [0, 0, 0, 1, 1, 2], [0], [0]>} : vector<4x16x16xf32>, vector<4x16x8xf32>, vector<4x16x8xf32> -> vector<4x16x8xf32>
    %17 = vector.extract_strided_slice %16 {offsets = [0, 0, 0], sizes = [4, 16, 1], strides = [1, 1, 1]} : vector<4x16x8xf32> to vector<4x16x1xf32>
    %c0_12 = arith.constant 0 : index
    %c0_13 = arith.constant 0 : index
    %c0_14 = arith.constant 0 : index
    %18 = vector.load %arg9[%c0_12, %c0_13, %c0_14] : memref<4x16x1xf32, #tpu.memory_space<vmem>>, vector<4x16x1xf32>
    %19 = arith.mulf %11, %18 : vector<4x16x1xf32>
    %20 = arith.addf %19, %17 : vector<4x16x1xf32>
    %c0_15 = arith.constant 0 : index
    %c0_16 = arith.constant 0 : index
    %c0_17 = arith.constant 0 : index
    %21 = vector.load %arg9[%c0_15, %c0_16, %c0_17] : memref<4x16x1xf32, #tpu.memory_space<vmem>>, vector<4x16x1xf32>
    tpu.vector_store %arg9[%c0_15, %c0_16, %c0_17], %20 {strides = array<i32>} : memref<4x16x1xf32, #tpu.memory_space<vmem>>, vector<4x16x1xf32>,
    %c0_18 = arith.constant 0 : index
    %c0_19 = arith.constant 0 : index
    %c0_20 = arith.constant 0 : index
    %22 = vector.load %arg10[%c0_18, %c0_19, %c0_20] : memref<4x16x8xf32, #tpu.memory_space<vmem>>, vector<4x16x8xf32>
    %23 = vector.broadcast %11 : vector<4x16x1xf32> to vector<4x16x8xf32>
    %24 = arith.mulf %23, %22 : vector<4x16x8xf32>
    %c0_21 = arith.constant 0 : index
    %c0_22 = arith.constant 0 : index
    %c0_23 = arith.constant 0 : index
    %25 = vector.load %arg6[%c0_21, %c0_22, %c0_23] : memref<4x16x8xf32, #tpu.memory_space<vmem>>, vector<4x16x8xf32>
    %cst_24 = arith.constant dense<0.000000e+00> : vector<4x16x8xf32>
    %26 = tpu.matmul %14, %25, %cst_24 {dimension_numbers = #tpu.dot_dimension_numbers<[2], [1], [1], [2], [0, 0, 0, 1, 1, 2], [0], [0]>} : vector<4x16x16xf32>, vector<4x16x8xf32>, vector<4x16x8xf32> -> vector<4x16x8xf32>
    %27 = arith.addf %24, %26 : vector<4x16x8xf32>
    %c0_25 = arith.constant 0 : index
    %c0_26 = arith.constant 0 : index
    %c0_27 = arith.constant 0 : index
    %28 = vector.load %arg10[%c0_25, %c0_26, %c0_27] : memref<4x16x8xf32, #tpu.memory_space<vmem>>, vector<4x16x8xf32>
    tpu.vector_store %arg10[%c0_25, %c0_26, %c0_27], %27 {strides = array<i32>} : memref<4x16x8xf32, #tpu.memory_space<vmem>>, vector<4x16x8xf32>,
    %c0_28 = arith.constant 0 : index
    %c0_29 = arith.constant 0 : index
    %c0_30 = arith.constant 0 : index
    %29 = vector.load %arg8[%c0_28, %c0_29, %c0_30] : memref<4x16x1xf32, #tpu.memory_space<vmem>>, vector<4x16x1xf32>
    tpu.vector_store %arg8[%c0_28, %c0_29, %c0_30], %9 {strides = array<i32>} : memref<4x16x1xf32, #tpu.memory_space<vmem>>, vector<4x16x1xf32>,
    %c0_i32_31 = arith.constant 0 : i32
    %30 = arith.cmpi eq, %arg3, %c0_i32_31 : i32
    %31 = arith.extui %30 : i1 to i32
    %c0_i32_32 = arith.constant 0 : i32
    %32 = arith.cmpi ne, %31, %c0_i32_32 : i32
    scf.if %32 {
      %c0_33 = arith.constant 0 : index
      %c0_34 = arith.constant 0 : index
      %c0_35 = arith.constant 0 : index
      %33 = vector.load %arg10[%c0_33, %c0_34, %c0_35] : memref<4x16x8xf32, #tpu.memory_space<vmem>>, vector<1x16x8xf32>
      %34 = vector.shape_cast %33 : vector<1x16x8xf32> to vector<16x8xf32>
      %c0_36 = arith.constant 0 : index
      %c0_37 = arith.constant 0 : index
      %c0_38 = arith.constant 0 : index
      %35 = vector.load %arg9[%c0_36, %c0_37, %c0_38] : memref<4x16x1xf32, #tpu.memory_space<vmem>>, vector<1x16x1xf32>
      %36 = vector.shape_cast %35 : vector<1x16x1xf32> to vector<16x1xf32>
      %37 = vector.broadcast %36 : vector<16x1xf32> to vector<16x8xf32>
      %38 = arith.divf %34, %37 : vector<16x8xf32>
      %c0_39 = arith.constant 0 : index
      %c0_40 = arith.constant 0 : index
      %39 = vector.load %arg7[%c0_39, %c0_40] : memref<16x32xf32, #tpu.memory_space<vmem>>, vector<16x8xf32>
      tpu.vector_store %arg7[%c0_39, %c0_40], %38 {strides = array<i32>} : memref<16x32xf32, #tpu.memory_space<vmem>>, vector<16x8xf32>,
      %c1 = arith.constant 1 : index
      %c0_41 = arith.constant 0 : index
      %c0_42 = arith.constant 0 : index
      %40 = vector.load %arg10[%c1, %c0_41, %c0_42] : memref<4x16x8xf32, #tpu.memory_space<vmem>>, vector<1x16x8xf32>
      %41 = vector.shape_cast %40 : vector<1x16x8xf32> to vector<16x8xf32>
      %c1_43 = arith.constant 1 : index
      %c0_44 = arith.constant 0 : index
      %c0_45 = arith.constant 0 : index
      %42 = vector.load %arg9[%c1_43, %c0_44, %c0_45] : memref<4x16x1xf32, #tpu.memory_space<vmem>>, vector<1x16x1xf32>
      %43 = vector.shape_cast %42 : vector<1x16x1xf32> to vector<16x1xf32>
      %44 = vector.broadcast %43 : vector<16x1xf32> to vector<16x8xf32>
      %45 = arith.divf %41, %44 : vector<16x8xf32>
      %c0_46 = arith.constant 0 : index
      %c8 = arith.constant 8 : index
      %46 = vector.load %arg7[%c0_46, %c8] : memref<16x32xf32, #tpu.memory_space<vmem>>, vector<16x8xf32>
      tpu.vector_store %arg7[%c0_46, %c8], %45 {strides = array<i32>} : memref<16x32xf32, #tpu.memory_space<vmem>>, vector<16x8xf32>,
      %c2 = arith.constant 2 : index
      %c0_47 = arith.constant 0 : index
      %c0_48 = arith.constant 0 : index
      %47 = vector.load %arg10[%c2, %c0_47, %c0_48] : memref<4x16x8xf32, #tpu.memory_space<vmem>>, vector<1x16x8xf32>
      %48 = vector.shape_cast %47 : vector<1x16x8xf32> to vector<16x8xf32>
      %c2_49 = arith.constant 2 : index
      %c0_50 = arith.constant 0 : index
      %c0_51 = arith.constant 0 : index
      %49 = vector.load %arg9[%c2_49, %c0_50, %c0_51] : memref<4x16x1xf32, #tpu.memory_space<vmem>>, vector<1x16x1xf32>
      %50 = vector.shape_cast %49 : vector<1x16x1xf32> to vector<16x1xf32>
      %51 = vector.broadcast %50 : vector<16x1xf32> to vector<16x8xf32>
      %52 = arith.divf %48, %51 : vector<16x8xf32>
      %c0_52 = arith.constant 0 : index
      %c16 = arith.constant 16 : index
      %53 = vector.load %arg7[%c0_52, %c16] : memref<16x32xf32, #tpu.memory_space<vmem>>, vector<16x8xf32>
      tpu.vector_store %arg7[%c0_52, %c16], %52 {strides = array<i32>} : memref<16x32xf32, #tpu.memory_space<vmem>>, vector<16x8xf32>,
      %c3 = arith.constant 3 : index
      %c0_53 = arith.constant 0 : index
      %c0_54 = arith.constant 0 : index
      %54 = vector.load %arg10[%c3, %c0_53, %c0_54] : memref<4x16x8xf32, #tpu.memory_space<vmem>>, vector<1x16x8xf32>
      %55 = vector.shape_cast %54 : vector<1x16x8xf32> to vector<16x8xf32>
      %c3_55 = arith.constant 3 : index
      %c0_56 = arith.constant 0 : index
      %c0_57 = arith.constant 0 : index
      %56 = vector.load %arg9[%c3_55, %c0_56, %c0_57] : memref<4x16x1xf32, #tpu.memory_space<vmem>>, vector<1x16x1xf32>
      %57 = vector.shape_cast %56 : vector<1x16x1xf32> to vector<16x1xf32>
      %58 = vector.broadcast %57 : vector<16x1xf32> to vector<16x8xf32>
      %59 = arith.divf %55, %58 : vector<16x8xf32>
      %c0_58 = arith.constant 0 : index
      %c24 = arith.constant 24 : index
      %60 = vector.load %arg7[%c0_58, %c24] : memref<16x32xf32, #tpu.memory_space<vmem>>, vector<16x8xf32>
      tpu.vector_store %arg7[%c0_58, %c24], %59 {strides = array<i32>} : memref<16x32xf32, #tpu.memory_space<vmem>>, vector<16x8xf32>,
    } else {
    }
    return
  }
  func.func @transform_0(%arg0: i32, %arg1: i32, %arg2: i32, %arg3: i32) -> (i32, i32, i32) {
    %c1_i32 = arith.constant 1 : i32
    %0 = arith.muli %arg0, %c1_i32 : i32
    %1 = arith.addi %0, %arg2 : i32
    %c0_i32 = arith.constant 0 : i32
    %c0_i32_0 = arith.constant 0 : i32
    return %arg1, %1, %c0_i32 : i32, i32, i32
  }
  func.func @transform_1(%arg0: i32, %arg1: i32, %arg2: i32, %arg3: i32) -> (i32, i32, i32) {
    %c1_i32 = arith.constant 1 : i32
    %0 = arith.muli %arg0, %c1_i32 : i32
    %1 = arith.addi %0, %arg3 : i32
    %c0_i32 = arith.constant 0 : i32
    %c0_i32_0 = arith.constant 0 : i32
    return %arg1, %1, %c0_i32 : i32, i32, i32
  }
  func.func @transform_2(%arg0: i32, %arg1: i32, %arg2: i32, %arg3: i32) -> (i32, i32, i32) {
    %c1_i32 = arith.constant 1 : i32
    %0 = arith.muli %arg0, %c1_i32 : i32
    %1 = arith.addi %0, %arg3 : i32
    %c0_i32 = arith.constant 0 : i32
    %c0_i32_0 = arith.constant 0 : i32
    return %arg1, %1, %c0_i32 : i32, i32, i32
  }
  func.func @transform_3(%arg0: i32, %arg1: i32, %arg2: i32, %arg3: i32) -> (i32, i32) {
    %c1_i32 = arith.constant 1 : i32
    %0 = arith.muli %arg0, %c1_i32 : i32
    %1 = arith.addi %0, %arg2 : i32
    %c0_i32 = arith.constant 0 : i32
    return %1, %arg1 : i32, i32
  }
}

</mosaic_0001>

<bundles_post_ra>
// kernel: attention_forward.5
= control target key start
LH: loop header
LB: loop body
LE: loop exit
PB: predicated region body
PF: predicated region fallthrough
CT: control target
= control target key end

     0   :  { %s269_s0 = inlined_call_operand.vmem [shape: f32[32,32], index: 0, kind: input, shape index: {}]   ;;  %s270_s1 = inlined_call_operand.vmem [shape: f32[32,32], index: 1, kind: input, shape index: {}]   ;;  %s271_s2 = inlined_call_operand.vmem [shape: f32[1,32], index: 2, kind: input, shape index: {}]   ;;  %s272_s3 = inlined_call_operand.hbm [shape: f32[32,32], index: 3, kind: output, shape index: {}]  }
   0x1   :  { %v22_v0 = vld [vmem:[%s270_s1 + $0x18] sm:$0xff]  ;;  %v21_v1 = vld [vmem:[%s270_s1 + $0x10] sm:$0xff]  ;;  %v20_v2 = vld [vmem:[%s270_s1 + $0x8] sm:$0xff] }
   0x2   :  { %161 = vmatprep.subr.mxu0 %v22_v0  ;;  %175 = vmatprep.subr.mxu1 %v22_v0 }
   0x3   :  { %162 = vmatpush3.msra.mxu0 %v22_v0  ;;  %179 = vmatpush3.msra.mxu1 %v22_v0 }
   0x4   :  { %8 = vsyncpa [#allocation3], 0  ;;  %163 = vmatprep.subr.mxu0 %v21_v1  ;;  %176 = vmatprep.subr.mxu1 %v21_v1  ;;  %v19_v3 = vld [vmem:[%s270_s1] sm:$0xff]  ;;  %vm30_vm0 = vcmask 261120   ;;  %v17_v5 = vld [vmem:[%s269_s0 + $0x10] sm:$0xff]  ;;  %s208_s29 = smov [#allocation2]  }
   0x5   :  { %164 = vmatpush3.msra.mxu0 %v21_v1  ;;  %180 = vmatpush3.msra.mxu1 %v21_v1  ;;  %v15_v4 = vld [vmem:[%s269_s0] sm:$0xff]  ;;  %v16_v6 = vld [vmem:[%s269_s0 + $0x8] sm:$0xff]  ;;  %v18_v7 = vld [vmem:[%s269_s0 + $0x18] sm:$0xff]  ;;  %s137_s30 = sshll.u32 %s208_s29, 4  ;;  %s138_s30 = int_to_ptr.vmem [resolvable:$true] %s137_s30 }
   0x6   :  { %165 = vmatprep.subr.mxu0 %v20_v2  ;;  %177 = vmatprep.subr.mxu1 %v20_v2  ;;  %v148_v8 = vld [vmem:[%s271_s2] ss:$0 sm:$0xff]  ;;  %s186_s0 = scalar_lea.vmem %s138_s30, 512  ;;  %p191_p1 = scmp.lt.s32.totalorder %s138_s30, %s138_s30 }
   0x7   :  { %166 = vmatpush3.msra.mxu0 %v20_v2  ;;  %181 = vmatpush3.msra.mxu1 %v20_v2  ;;  %p187_p0 = scmp.ne.s32.totalorder %s138_s30, %s186_s0  ;;  %p192_p2 = scmp.lt.s32.totalorder %s186_s0, %s186_s0 }
   0x8   :  { %167 = vmatprep.subr.mxu0 %v19_v3  ;;  %178 = vmatprep.subr.mxu1 %v19_v3 }
   0x9   :  { %168 = vmatpush3.msra.mxu0 %v19_v3  ;;  %182 = vmatpush3.msra.mxu1 %v19_v3  ;;  %p193_p3 = por %p192_p2, %p191_p1 }
   0xa   :  { %169 = vmatprep.mubr.msk.f32.mxu0 %vm30_vm0, %v15_v4  ;;  %172 = vmatprep.mubr.msk.f32.mxu1 %vm30_vm0, %v17_v5 }
   0xb   :  { %170 = vmatmul.mubr.msk.f32.vlgmr.msra.gmra.mxu0 %vm30_vm0, %v16_v6  ;;  %173 = vmatmul.mubr.msk.f32.vlgmr.msra.gmra.mxu1 %vm30_vm0, %v18_v7  ;;  %p194_p4 = pnand %p193_p3, %p187_p0 }
  0xcb   :  { %v171_v9 = vpop.f32.mrf.mxu0  ;;  %v174_v10 = vpop.f32.mrf.mxu1 }
  0xcc   :  { %v115_v11 = vadd.f32 %v171_v9, %v148_v8  ;;  %v125_v12 = vadd.f32 %v174_v10, %v148_v8 }
  0xcd   :  { %v109_v13 = vpop.f32.mrf.mxu0  ;;  %v119_v14 = vpop.f32.mrf.mxu1 }
  0xce   :  { %129 = vst.msk [vmem:[#allocation2 + $0x8] sm:$0xff] %vm30_vm0, %v115_v11  ;;  %131 = vst.msk [vmem:[#allocation2 + $0x18] sm:$0xff] %vm30_vm0, %v125_v12  ;;  %v110_v15 = vadd.f32 %v148_v8, %v109_v13  ;;  %v120_v16 = vadd.f32 %v148_v8, %v119_v14 }
  0xd0   :  { %128 = vst.msk [vmem:[#allocation2] sm:$0xff] %vm30_vm0, %v110_v15  ;;  %130 = vst.msk [vmem:[#allocation2 + $0x10] sm:$0xff] %vm30_vm0, %v120_v16 }
  0xd1   :  { %197 = shalt.err (!%p194_p4)
}
  0xd2   :  { %s209_s2 = smov 128   ;;  %s210_s4 = smov 8  }
  0xd3   :  { %143 = dma.vmem_to_hbm [thread:$0]  %s138_s30, 512, %s272_s3, [#allocation3], %s209_s2, %s209_s2, %s210_s4  }
  0xd4   :  { %206 = dma.done.wait [#allocation3], 512  }
  0xd5   :  { %207 = vsyncadd [#allocation3], 4294966784 }
  0xd6   :  { %147 = vsyncpa [#allocation3], 1 }

// kernel: attention_forward.3
= control target key start
LH: loop header
LB: loop body
LE: loop exit
PB: predicated region body
PF: predicated region fallthrough
CT: control target
= control target key end

     0   :  { %11 = vsyncpa [#allocation3], 0  ;;  %s1016_s0 = inlined_call_operand.hbm [shape: f32[32,32], index: 0, kind: input, shape index: {}]   ;;  %s1017_s1 = inlined_call_operand.hbm [shape: f32[3,1,32,32], index: 1, kind: input, shape index: {}]   ;;  %s1018_s2 = inlined_call_operand.vmem [shape: f32[3,1,1,32], index: 2, kind: input, shape index: {}]   ;;  %s1019_s3 = inlined_call_operand.vmem [shape: f32[4,32,8], index: 3, kind: output, shape index: {0}]   ;;  %s1020_s4 = inlined_call_operand.vmem [shape: f32[4,32,8], index: 4, kind: output, shape index: {1}]   ;;  %s1021_s5 = inlined_call_operand.vmem [shape: f32[4,32,8], index: 5, kind: output, shape index: {2}]  }
   0x1   :  { %12 = vsyncpa [#allocation5], 0  ;;  %s724_s18 = smov [#allocation2]  }
   0x2   :  { %s18_s19 = sshll.u32 %s724_s18, 4  ;;  %s19_s19 = int_to_ptr.vmem [resolvable:$true] %s18_s19 }
   0x3   :  { %s688_s20 = scalar_lea.vmem %s19_s19, 512  ;;  %p693_p1 = scmp.lt.s32.totalorder %s19_s19, %s19_s19 }
   0x4   :  { %p689_p0 = scmp.ne.s32.totalorder %s19_s19, %s688_s20  ;;  %p694_p2 = scmp.lt.s32.totalorder %s688_s20, %s688_s20 }
   0x6   :  { %p695_p3 = por %p694_p2, %p693_p1 }
   0x8   :  { %p696_p4 = pnand %p695_p3, %p689_p0 }
   0xa   :  { %699 = shalt.err (!%p696_p4)
}
   0xb   :  { %s725_s21 = smov 128   ;;  %s726_s22 = smov 8  }
   0xc   :  { %24 = dma.hbm_to_vmem [thread:$0]  %s1016_s0, 512, %s19_s19, [#allocation3], %s725_s21, %s725_s21, %s726_s22  }
   0xd   :  { %s727_s25 = smov [#allocation4]  }
   0xe   :  { %s30_s26 = sshll.u32 %s727_s25, 4  ;;  %s31_s26 = int_to_ptr.vmem [resolvable:$true] %s30_s26 }
   0xf   :  { %s708_s27 = scalar_lea.vmem %s31_s26, 1536  ;;  %p713_p6 = scmp.lt.s32.totalorder %s31_s26, %s31_s26 }
  0x10   :  { %p709_p5 = scmp.ne.s32.totalorder %s31_s26, %s708_s27  ;;  %p714_p7 = scmp.lt.s32.totalorder %s708_s27, %s708_s27 }
  0x12   :  { %p715_p8 = por %p714_p7, %p713_p6 }
  0x14   :  { %p716_p9 = pnand %p715_p8, %p709_p5 }
  0x16   :  { %719 = shalt.err (!%p716_p9)
}
  0x17   :  { %36 = dma.hbm_to_vmem [thread:$0]  %s1017_s1, 1536, %s31_s26, [#allocation5], %s725_s21, %s725_s21, %s726_s22  }
  0x18   :  { %720 = dma.done.wait [#allocation3], 512  }
  0x19   :  { %721 = vsyncadd [#allocation3], 4294966784 }
  0x1a   :  { %722 = dma.done.wait [#allocation5], 1536  }
  0x1b   :  { %723 = vsyncadd [#allocation5], 4294965760  ;;  %v52_v0 = vld [vmem:[#allocation4 + $0x18] sm:$0xff]  ;;  %v51_v1 = vld [vmem:[#allocation4 + $0x10] sm:$0xff]  ;;  %vm60_vm0 = vcmask 261120   ;;  %vm158_vm1 = vcmask 64512  }
  0x1c   :  { %623 = vmatprep.subr.mxu0 %v52_v0  ;;  %v222_v2 = vld [vmem:[#allocation4 + $0x38] sm:$0xff]  ;;  %v45_v3 = vld [vmem:[#allocation2] sm:$0xff]  ;;  %v50_v4 = vld [vmem:[#allocation4 + $0x8] sm:$0xff]  ;;  %s728_s9 = smov 112   ;;  %s729_s10 = smov 120  }
  0x1d   :  { %624 = vmatpush3.msra.mxu0 %v52_v0  ;;  %637 = vmatprep.subr.mxu1 %v222_v2  ;;  %v221_v5 = vld [vmem:[#allocation4 + $0x30] sm:$0xff]  ;;  %v49_v6 = vld [vmem:[#allocation4] sm:$0xff]  ;;  %v220_v7 = vld [vmem:[#allocation4 + $0x28] sm:$0xff]  ;;  %s730_s15 = smov 104  }
  0x1e   :  { %625 = vmatprep.subr.mxu0 %v51_v1  ;;  %631 = vmatprep.mubr.msk.f32.mxu0 %vm60_vm0, %v45_v3  ;;  %v46_v8 = vld [vmem:[#allocation2 + $0x8] sm:$0xff]  ;;  %v219_v9 = vld [vmem:[#allocation4 + $0x20] sm:$0xff]  ;;  %v47_v10 = vld [vmem:[#allocation2 + $0x10] sm:$0xff] }
  0x1f   :  { %626 = vmatpush3.msra.mxu0 %v51_v1  ;;  %638 = vmatpush3.msra.mxu1 %v222_v2  ;;  %v379_v11 = vld [vmem:[#allocation4 + $0x58] sm:$0xff]  ;;  %v378_v13 = vld [vmem:[#allocation4 + $0x50] sm:$0xff]  ;;  %v377_v14 = vld [vmem:[#allocation4 + $0x48] sm:$0xff] }
  0x20   :  { %627 = vmatprep.subr.mxu0 %v50_v4  ;;  %639 = vmatprep.subr.mxu1 %v221_v5  ;;  %v48_v12 = vld [vmem:[#allocation2 + $0x18] sm:$0xff]  ;;  %v376_v15 = vld [vmem:[#allocation4 + $0x40] sm:$0xff] }
  0x21   :  { %628 = vmatpush3.msra.mxu0 %v50_v4  ;;  %640 = vmatpush3.msra.mxu1 %v221_v5  ;;  %v546_v16 = vld [vmem:[%s1018_s2] ss:$0 sm:$0xff]  ;;  %v564_v18 = vld [vmem:[%s1018_s2 + $0x1] ss:$0 sm:$0xff]  ;;  %v582_v34 = vld [vmem:[%s1018_s2 + $0x2] ss:$0 sm:$0xff] }
  0x22   :  { %629 = vmatprep.subr.mxu0 %v49_v6  ;;  %641 = vmatprep.subr.mxu1 %v220_v7 }
  0x23   :  { %630 = vmatpush3.msra.mxu0 %v49_v6  ;;  %642 = vmatpush3.msra.mxu1 %v220_v7 }
  0x24   :  { %632 = vmatmul.mubr.msk.f32.vlgmr.msra.gmra.mxu0 %vm60_vm0, %v46_v8  ;;  %643 = vmatprep.subr.mxu1 %v219_v9 }
  0x25   :  { %644 = vmatpush3.msra.mxu1 %v219_v9  ;;  %645 = vmatprep.mubr.msk.f32.mxu1 %vm60_vm0, %v45_v3 }
  0x26   :  { %646 = vmatmul.mubr.msk.f32.vlgmr.msra.gmra.mxu1 %vm60_vm0, %v46_v8  ;;  %634 = vmatprep.mubr.msk.f32.mxu0 %vm60_vm0, %v47_v10 }
  0x27   :  { %648 = vmatprep.mubr.msk.f32.mxu1 %vm60_vm0, %v47_v10  ;;  %651 = vmatprep.subr.mxu0 %v379_v11 }
  0x28   :  { %635 = vmatmul.mubr.msk.f32.gmra.mxu0 %vm60_vm0, %v48_v12  ;;  %665 = vmatprep.subr.mxu1 %v379_v11 }
  0x29   :  { %652 = vmatpush3.msra.mxu0 %v379_v11  ;;  %669 = vmatpush3.msra.mxu1 %v379_v11 }
  0x2a   :  { %649 = vmatmul.mubr.msk.f32.gmra.mxu1 %vm60_vm0, %v48_v12  ;;  %653 = vmatprep.subr.mxu0 %v378_v13 }
  0x2b   :  { %654 = vmatpush3.msra.mxu0 %v378_v13  ;;  %666 = vmatprep.subr.mxu1 %v378_v13 }
  0x2c   :  { %655 = vmatprep.subr.mxu0 %v377_v14  ;;  %670 = vmatpush3.msra.mxu1 %v378_v13 }
  0x2d   :  { %656 = vmatpush3.msra.mxu0 %v377_v14  ;;  %659 = vmatprep.mubr.msk.f32.mxu0 %vm60_vm0, %v45_v3 }
  0x2e   :  { %657 = vmatprep.subr.mxu0 %v376_v15  ;;  %667 = vmatprep.subr.mxu1 %v377_v14 }
  0x2f   :  { %658 = vmatpush3.msra.mxu0 %v376_v15  ;;  %671 = vmatpush3.msra.mxu1 %v377_v14 }
  0x30   :  { %660 = vmatmul.mubr.msk.f32.vlgmr.msra.gmra.mxu0 %vm60_vm0, %v46_v8  ;;  %668 = vmatprep.subr.mxu1 %v376_v15 }
  0x31   :  { %672 = vmatpush3.msra.mxu1 %v376_v15  ;;  %662 = vmatprep.mubr.msk.f32.mxu1 %vm60_vm0, %v47_v10 }
  0x32   :  { %663 = vmatmul.mubr.msk.f32.vlgmr.msra.gmra.mxu1 %vm60_vm0, %v48_v12 }
  0xe4   :  { %v633_v17 = vpop.f32.mrf.mxu0 }
  0xe5   :  { %v145_v19 = vadd.f32 %v633_v17, %v546_v16 }
  0xe6   :  { %v139_v20 = vpop.f32.mrf.mxu0  ;;  %v647_v21 = vpop.f32.mrf.mxu1 }
  0xe7   :  { %160 = vst.msk [vmem:[%s1019_s3 + $0x8] sm:$0xff] %vm158_vm1, %v145_v19  ;;  %v140_v22 = vadd.f32 %v546_v16, %v139_v20  ;;  %186 = vrot.lane.b32.xlu1 %v145_v19, %s728_s9  ;;  %169 = vrot.lane.b32.xlu0 %v145_v19, %s729_s10  ;;  %v303_v23 = vadd.f32 %v647_v21, %v564_v18 }
  0xe8   :  { %v297_v24 = vpop.f32.mrf.mxu1  ;;  %v636_v25 = vpop.f32.mrf.mxu0 }
  0xe9   :  { %159 = vst.msk [vmem:[%s1019_s3] sm:$0xff] %vm158_vm1, %v140_v22  ;;  %317 = vst.msk [vmem:[%s1020_s4 + $0x8] sm:$0xff] %vm158_vm1, %v303_v23  ;;  %v298_v26 = vadd.f32 %v564_v18, %v297_v24  ;;  %v155_v27 = vadd.f32 %v636_v25, %v546_v16 }
  0xea   :  { %v149_v28 = vpop.f32.mrf.mxu0  ;;  %v650_v29 = vpop.f32.mrf.mxu1 }
  0xeb   :  { %203 = vrot.lane.b32.xlu1 %v145_v19, %s730_s15  ;;  %167 = vrot.lane.b32.xlu0 %v140_v22, %s729_s10  ;;  %316 = vst.msk [vmem:[%s1020_s4] sm:$0xff] %vm158_vm1, %v298_v26  ;;  %162 = vst.msk [vmem:[%s1019_s3 + $0x18] sm:$0xff] %vm158_vm1, %v155_v27  ;;  %v150_v30 = vadd.f32 %v546_v16, %v149_v28  ;;  %v313_v31 = vadd.f32 %v650_v29, %v564_v18 }
  0xec   :  { %v307_v32 = vpop.f32.mrf.mxu1 }
  0xed   :  { %161 = vst.msk [vmem:[%s1019_s3 + $0x10] sm:$0xff] %vm158_vm1, %v150_v30  ;;  %319 = vst.msk [vmem:[%s1020_s4 + $0x18] sm:$0xff] %vm158_vm1, %v313_v31  ;;  %v308_v33 = vadd.f32 %v564_v18, %v307_v32 }
  0xef   :  { %326 = vrot.lane.b32.xlu1 %v303_v23, %s729_s10  ;;  %184 = vrot.lane.b32.xlu0 %v140_v22, %s728_s9  ;;  %318 = vst.msk [vmem:[%s1020_s4 + $0x10] sm:$0xff] %vm158_vm1, %v308_v33 }
  0xf0   :  { %v661_v35 = vpop.f32.mrf.mxu0 }
  0xf1   :  { %v460_v36 = vadd.f32 %v661_v35, %v582_v34 }
  0xf2   :  { %v454_v37 = vpop.f32.mrf.mxu0  ;;  %v664_v38 = vpop.f32.mrf.mxu1 }
  0xf3   :  { %343 = vrot.lane.b32.xlu1 %v303_v23, %s728_s9  ;;  %201 = vrot.lane.b32.xlu0 %v140_v22, %s730_s15  ;;  %474 = vst.msk [vmem:[%s1021_s5 + $0x8] sm:$0xff] %vm158_vm1, %v460_v36  ;;  %v455_v39 = vadd.f32 %v582_v34, %v454_v37  ;;  %v470_v40 = vadd.f32 %v664_v38, %v582_v34 }
  0xf4   :  { %v464_v41 = vpop.f32.mrf.mxu1 }
  0xf5   :  { %473 = vst.msk [vmem:[%s1021_s5] sm:$0xff] %vm158_vm1, %v455_v39  ;;  %476 = vst.msk [vmem:[%s1021_s5 + $0x18] sm:$0xff] %vm158_vm1, %v470_v40  ;;  %v465_v42 = vadd.f32 %v582_v34, %v464_v41 }
  0xf7   :  { %360 = vrot.lane.b32.xlu1 %v303_v23, %s730_s15  ;;  %324 = vrot.lane.b32.xlu0 %v298_v26, %s729_s10  ;;  %475 = vst.msk [vmem:[%s1021_s5 + $0x10] sm:$0xff] %vm158_vm1, %v465_v42 }
  0xfb   :  { %173 = vrot.lane.b32.xlu1 %v155_v27, %s729_s10  ;;  %341 = vrot.lane.b32.xlu0 %v298_v26, %s728_s9 }
  0xff   :  { %190 = vrot.lane.b32.xlu1 %v155_v27, %s728_s9  ;;  %358 = vrot.lane.b32.xlu0 %v298_v26, %s730_s15 }
 0x103   :  { %207 = vrot.lane.b32.xlu1 %v155_v27, %s730_s15  ;;  %188 = vrot.lane.b32.xlu0 %v150_v30, %s728_s9 }
 0x107   :  { %330 = vrot.lane.b32.xlu1 %v313_v31, %s729_s10  ;;  %205 = vrot.lane.b32.xlu0 %v150_v30, %s730_s15 }
 0x10b   :  { %347 = vrot.lane.b32.xlu1 %v313_v31, %s728_s9  ;;  %328 = vrot.lane.b32.xlu0 %v308_v33, %s729_s10 }
 0x10f   :  { %364 = vrot.lane.b32.xlu1 %v313_v31, %s730_s15  ;;  %345 = vrot.lane.b32.xlu0 %v308_v33, %s728_s9 }
 0x113   :  { %171 = vrot.lane.b32.xlu1 %v150_v30, %s729_s10  ;;  %362 = vrot.lane.b32.xlu0 %v308_v33, %s730_s15 }
 0x117   :  { %483 = vrot.lane.b32.xlu1 %v460_v36, %s729_s10  ;;  %481 = vrot.lane.b32.xlu0 %v455_v39, %s729_s10 }
 0x11b   :  { %487 = vrot.lane.b32.xlu1 %v470_v40, %s729_s10  ;;  %485 = vrot.lane.b32.xlu0 %v465_v42, %s729_s10 }
 0x11f   :  { %500 = vrot.lane.b32.xlu1 %v460_v36, %s728_s9  ;;  %498 = vrot.lane.b32.xlu0 %v455_v39, %s728_s9 }
 0x123   :  { %504 = vrot.lane.b32.xlu1 %v470_v40, %s728_s9  ;;  %502 = vrot.lane.b32.xlu0 %v465_v42, %s728_s9 }
 0x127   :  { %517 = vrot.lane.b32.xlu1 %v460_v36, %s730_s15  ;;  %515 = vrot.lane.b32.xlu0 %v455_v39, %s730_s15 }
 0x12b   :  { %521 = vrot.lane.b32.xlu1 %v470_v40, %s730_s15  ;;  %519 = vrot.lane.b32.xlu0 %v465_v42, %s730_s15 }
 0x159   :  { %v187_v43 = vpop.permute.xlu1 %186  ;;  %v170_v44 = vpop.permute.xlu0 %169 }
 0x15a   :  { %556 = vst.msk [vmem:[%s1019_s3 + $0x48] sm:$0xff] %vm158_vm1, %v187_v43  ;;  %552 = vst.msk [vmem:[%s1019_s3 + $0x28] sm:$0xff] %vm158_vm1, %v170_v44 }
 0x15d   :  { %v204_v45 = vpop.permute.xlu1 %203  ;;  %v168_v46 = vpop.permute.xlu0 %167 }
 0x15e   :  { %560 = vst.msk [vmem:[%s1019_s3 + $0x68] sm:$0xff] %vm158_vm1, %v204_v45  ;;  %551 = vst.msk [vmem:[%s1019_s3 + $0x20] sm:$0xff] %vm158_vm1, %v168_v46 }
 0x161   :  { %v327_v47 = vpop.permute.xlu1 %326  ;;  %v185_v48 = vpop.permute.xlu0 %184 }
 0x162   :  { %570 = vst.msk [vmem:[%s1020_s4 + $0x28] sm:$0xff] %vm158_vm1, %v327_v47  ;;  %555 = vst.msk [vmem:[%s1019_s3 + $0x40] sm:$0xff] %vm158_vm1, %v185_v48 }
 0x165   :  { %v344_v49 = vpop.permute.xlu1 %343  ;;  %v202_v50 = vpop.permute.xlu0 %201 }
 0x166   :  { %574 = vst.msk [vmem:[%s1020_s4 + $0x48] sm:$0xff] %vm158_vm1, %v344_v49  ;;  %559 = vst.msk [vmem:[%s1019_s3 + $0x60] sm:$0xff] %vm158_vm1, %v202_v50 }
 0x169   :  { %v361_v51 = vpop.permute.xlu1 %360  ;;  %v325_v52 = vpop.permute.xlu0 %324 }
 0x16a   :  { %578 = vst.msk [vmem:[%s1020_s4 + $0x68] sm:$0xff] %vm158_vm1, %v361_v51  ;;  %569 = vst.msk [vmem:[%s1020_s4 + $0x20] sm:$0xff] %vm158_vm1, %v325_v52 }
 0x16d   :  { %v174_v53 = vpop.permute.xlu1 %173  ;;  %v342_v54 = vpop.permute.xlu0 %341 }
 0x16e   :  { %554 = vst.msk [vmem:[%s1019_s3 + $0x38] sm:$0xff] %vm158_vm1, %v174_v53  ;;  %573 = vst.msk [vmem:[%s1020_s4 + $0x40] sm:$0xff] %vm158_vm1, %v342_v54 }
 0x171   :  { %v191_v55 = vpop.permute.xlu1 %190  ;;  %v359_v56 = vpop.permute.xlu0 %358 }
 0x172   :  { %558 = vst.msk [vmem:[%s1019_s3 + $0x58] sm:$0xff] %vm158_vm1, %v191_v55  ;;  %577 = vst.msk [vmem:[%s1020_s4 + $0x60] sm:$0xff] %vm158_vm1, %v359_v56 }
 0x175   :  { %v208_v57 = vpop.permute.xlu1 %207  ;;  %v189_v58 = vpop.permute.xlu0 %188 }
 0x176   :  { %562 = vst.msk [vmem:[%s1019_s3 + $0x78] sm:$0xff] %vm158_vm1, %v208_v57  ;;  %557 = vst.msk [vmem:[%s1019_s3 + $0x50] sm:$0xff] %vm158_vm1, %v189_v58 }
 0x179   :  { %v331_v59 = vpop.permute.xlu1 %330  ;;  %v206_v60 = vpop.permute.xlu0 %205 }
 0x17a   :  { %572 = vst.msk [vmem:[%s1020_s4 + $0x38] sm:$0xff] %vm158_vm1, %v331_v59  ;;  %561 = vst.msk [vmem:[%s1019_s3 + $0x70] sm:$0xff] %vm158_vm1, %v206_v60 }
 0x17d   :  { %v348_v61 = vpop.permute.xlu1 %347  ;;  %v329_v62 = vpop.permute.xlu0 %328 }
 0x17e   :  { %576 = vst.msk [vmem:[%s1020_s4 + $0x58] sm:$0xff] %vm158_vm1, %v348_v61  ;;  %571 = vst.msk [vmem:[%s1020_s4 + $0x30] sm:$0xff] %vm158_vm1, %v329_v62 }
 0x181   :  { %v365_v63 = vpop.permute.xlu1 %364  ;;  %v346_v0 = vpop.permute.xlu0 %345 }
 0x182   :  { %580 = vst.msk [vmem:[%s1020_s4 + $0x78] sm:$0xff] %vm158_vm1, %v365_v63  ;;  %575 = vst.msk [vmem:[%s1020_s4 + $0x50] sm:$0xff] %vm158_vm1, %v346_v0 }
 0x185   :  { %v172_v1 = vpop.permute.xlu1 %171  ;;  %v363_v2 = vpop.permute.xlu0 %362 }
 0x186   :  { %553 = vst.msk [vmem:[%s1019_s3 + $0x30] sm:$0xff] %vm158_vm1, %v172_v1  ;;  %579 = vst.msk [vmem:[%s1020_s4 + $0x70] sm:$0xff] %vm158_vm1, %v363_v2 }
 0x189   :  { %v484_v3 = vpop.permute.xlu1 %483  ;;  %v482_v4 = vpop.permute.xlu0 %481 }
 0x18a   :  { %588 = vst.msk [vmem:[%s1021_s5 + $0x28] sm:$0xff] %vm158_vm1, %v484_v3  ;;  %587 = vst.msk [vmem:[%s1021_s5 + $0x20] sm:$0xff] %vm158_vm1, %v482_v4 }
 0x18d   :  { %v488_v5 = vpop.permute.xlu1 %487  ;;  %v486_v6 = vpop.permute.xlu0 %485 }
 0x18e   :  { %590 = vst.msk [vmem:[%s1021_s5 + $0x38] sm:$0xff] %vm158_vm1, %v488_v5  ;;  %589 = vst.msk [vmem:[%s1021_s5 + $0x30] sm:$0xff] %vm158_vm1, %v486_v6 }
 0x191   :  { %v501_v7 = vpop.permute.xlu1 %500  ;;  %v499_v8 = vpop.permute.xlu0 %498 }
 0x192   :  { %592 = vst.msk [vmem:[%s1021_s5 + $0x48] sm:$0xff] %vm158_vm1, %v501_v7  ;;  %591 = vst.msk [vmem:[%s1021_s5 + $0x40] sm:$0xff] %vm158_vm1, %v499_v8 }
 0x195   :  { %v505_v9 = vpop.permute.xlu1 %504  ;;  %v503_v10 = vpop.permute.xlu0 %502 }
 0x196   :  { %594 = vst.msk [vmem:[%s1021_s5 + $0x58] sm:$0xff] %vm158_vm1, %v505_v9  ;;  %593 = vst.msk [vmem:[%s1021_s5 + $0x50] sm:$0xff] %vm158_vm1, %v503_v10 }
 0x199   :  { %v518_v11 = vpop.permute.xlu1 %517  ;;  %v516_v12 = vpop.permute.xlu0 %515 }
 0x19a   :  { %596 = vst.msk [vmem:[%s1021_s5 + $0x68] sm:$0xff] %vm158_vm1, %v518_v11  ;;  %595 = vst.msk [vmem:[%s1021_s5 + $0x60] sm:$0xff] %vm158_vm1, %v516_v12 }
 0x19d   :  { %v522_v13 = vpop.permute.xlu1 %521  ;;  %v520_v14 = vpop.permute.xlu0 %519 }
 0x19e   :  { %598 = vst.msk [vmem:[%s1021_s5 + $0x78] sm:$0xff] %vm158_vm1, %v522_v13  ;;  %597 = vst.msk [vmem:[%s1021_s5 + $0x70] sm:$0xff] %vm158_vm1, %v520_v14 }
 0x19f   :  { %544 = vsyncpa [#allocation3], 1 }
 0x1a0   :  { %545 = vsyncpa [#allocation5], 1 }

// kernel: attention_forward.4
= control target key start
LH: loop header
LB: loop body
LE: loop exit
PB: predicated region body
PF: predicated region fallthrough
CT: control target
= control target key end

     0   :  { %s2351_s12 = smov 0   ;;  %s2353_s13 = smov 0   ;;  %s2703_s0 = inlined_call_operand.vmem [shape: f32[4,32,8], index: 0, kind: input, shape index: {}]   ;;  %s2704_s1 = inlined_call_operand.vmem [shape: f32[4,32,8], index: 1, kind: input, shape index: {}]   ;;  %s2705_s2 = inlined_call_operand.vmem [shape: f32[4,32,8], index: 2, kind: input, shape index: {}]   ;;  %s2706_s3 = inlined_call_operand.vmem [shape: f32[32,32], index: 3, kind: output, shape index: {}]  }
   0x1   :  { %s2355_s14 = smov 0   ;;  %s2357_s15 = smov 0  }
   0x2   :  { %s2359_s16 = smov 0  }
   0x3 LB: > { %s39_s17 = sadd.s32 1, %s2318_s15  ;;  %p57_p1 = scmp.ne.s32.totalorder %s2310_s13, %s2306_s12  ;;  %s2322_s16 = sphi %s2359_s16, %s13_s16   ;;  %s2318_s15 = sphi %s2357_s15, %s2711_s15   ;;  %s2314_s14 = sphi %s2355_s14, %s2710_s14   ;;  %s2310_s13 = sphi %s2353_s13, %s2709_s13   ;;  %s2306_s12 = sphi %s2351_s12, %s2708_s12  }
   0x4   : > { %p41_p0 = scmp.ge.s32.totalorder %s39_s17, 2  ;;  %p58_p2 = scmp.eq.s32.totalorder %s2322_s16, 0 }
   0x5   : > { %s50_s20 = sadd.s32 1, %s2310_s13  ;;  %p2002_p5 = scmp.ge.s32.totalorder %s2322_s16, 2 }
   0x6   : > { %s2713_s17 = smov (%p41_p0, %s39_s17), 0  ;;  %p2382_p3 = por %p58_p2, %p57_p1 }
   0x7   : > { %s46_s19 = ssub.s32 %s2318_s15, %s2713_s17  ;;  %173 = sbr.rel (%p2002_p5) target bundleno = 36 (0x24), region = 16 }
   0x8   : > { %p48_p4 = scmp.eq.s32.totalorder %s46_s19, 0 }
   0xa   : > { %s2390_s21 = scalar_select %p48_p4, %s2310_s13, %s50_s20  }
   0xc   : > { %176 = sbr.rel (!%p2382_p3) target bundleno = 20 (0x14), region = 20  ;;  %s178_s22 = sand.u32 (%p2382_p3), 1, %s2310_s13  }
   0xd   : > { %s2052_s23 = sshll.u32 (%p2382_p3), %s2318_s15, 4  ;;  %s2003_s24 = sshll.u32 (%p2382_p3), %s178_s22, 6 }
   0xe   : > { %s187_s27 = scalar_lea.vmem (%p2382_p3), %s2703_s0, %s2052_s23  ;;  %s180_s28 = scalar_lea.vmem (%p2382_p3), [#allocation5], %s2003_s24 }
   0xf   : > { %v230_v0 = vld [vmem:[%s187_s27] sm:$0xff] (%p2382_p3)  ;;  %v232_v1 = vld [vmem:[%s187_s27 + $0x8] sm:$0xff] (%p2382_p3) }
  0x10   : > { %v234_v2 = vld [vmem:[%s187_s27 + $0x20] sm:$0xff] (%p2382_p3)  ;;  %231 = vst [vmem:[%s180_s28] sm:$0xff] (%p2382_p3), %v230_v0  ;;  %233 = vst [vmem:[%s180_s28 + $0x8] sm:$0xff] (%p2382_p3), %v232_v1  ;;  %v236_v3 = vld [vmem:[%s187_s27 + $0x28] sm:$0xff] (%p2382_p3) }
  0x11   : > { %235 = vst [vmem:[%s180_s28 + $0x10] sm:$0xff] %v234_v2  ;;  %v238_v4 = vld [vmem:[%s187_s27 + $0x40] sm:$0xff]  ;;  %v240_v5 = vld [vmem:[%s187_s27 + $0x48] sm:$0xff]  ;;  %237 = vst [vmem:[%s180_s28 + $0x18] sm:$0xff] %v236_v3 }
  0x12   : > { %239 = vst [vmem:[%s180_s28 + $0x20] sm:$0xff] %v238_v4  ;;  %241 = vst [vmem:[%s180_s28 + $0x28] sm:$0xff] %v240_v5  ;;  %v242_v6 = vld [vmem:[%s187_s27 + $0x60] sm:$0xff]  ;;  %v244_v7 = vld [vmem:[%s187_s27 + $0x68] sm:$0xff] }
  0x13   : > { %243 = vst [vmem:[%s180_s28 + $0x30] sm:$0xff] %v242_v6  ;;  %245 = vst [vmem:[%s180_s28 + $0x38] sm:$0xff] %v244_v7 }
  0x14 PF: > { %251 = sbr.rel (!%p2382_p3) target bundleno = 28 (0x1c), region = 58  ;;  %s253_s29 = sand.u32 (%p2382_p3), 1, %s2310_s13  }
  0x15   : > { %s2053_s30 = sshll.u32 (%p2382_p3), %s2318_s15, 4  ;;  %s2006_s4 = sshll.u32 (%p2382_p3), %s253_s29, 6 }
  0x16   : > { %s262_s7 = scalar_lea.vmem (%p2382_p3), %s2704_s1, %s2053_s30  ;;  %s255_s8 = scalar_lea.vmem (%p2382_p3), [#allocation6], %s2006_s4 }
  0x17   : > { %v305_v8 = vld [vmem:[%s262_s7] sm:$0xff] (%p2382_p3)  ;;  %v307_v9 = vld [vmem:[%s262_s7 + $0x8] sm:$0xff] (%p2382_p3) }
  0x18   : > { %v309_v10 = vld [vmem:[%s262_s7 + $0x20] sm:$0xff] (%p2382_p3)  ;;  %306 = vst [vmem:[%s255_s8] sm:$0xff] (%p2382_p3), %v305_v8  ;;  %308 = vst [vmem:[%s255_s8 + $0x8] sm:$0xff] (%p2382_p3), %v307_v9  ;;  %v311_v11 = vld [vmem:[%s262_s7 + $0x28] sm:$0xff] (%p2382_p3) }
  0x19   : > { %310 = vst [vmem:[%s255_s8 + $0x10] sm:$0xff] %v309_v10  ;;  %v313_v12 = vld [vmem:[%s262_s7 + $0x40] sm:$0xff]  ;;  %v315_v13 = vld [vmem:[%s262_s7 + $0x48] sm:$0xff]  ;;  %312 = vst [vmem:[%s255_s8 + $0x18] sm:$0xff] %v311_v11 }
  0x1a   : > { %314 = vst [vmem:[%s255_s8 + $0x20] sm:$0xff] %v313_v12  ;;  %316 = vst [vmem:[%s255_s8 + $0x28] sm:$0xff] %v315_v13  ;;  %v317_v14 = vld [vmem:[%s262_s7 + $0x60] sm:$0xff]  ;;  %v319_v15 = vld [vmem:[%s262_s7 + $0x68] sm:$0xff] }
  0x1b   : > { %318 = vst [vmem:[%s255_s8 + $0x30] sm:$0xff] %v317_v14  ;;  %320 = vst [vmem:[%s255_s8 + $0x38] sm:$0xff] %v319_v15 }
  0x1c PF: > { %326 = sbr.rel (!%p2382_p3) target bundleno = 36 (0x24), region = 96  ;;  %s328_s9 = sand.u32 (%p2382_p3), 1, %s2310_s13  }
  0x1d   : > { %s2054_s10 = sshll.u32 (%p2382_p3), %s2318_s15, 4  ;;  %s2009_s11 = sshll.u32 (%p2382_p3), %s328_s9, 6 }
  0x1e   : > { %s337_s22 = scalar_lea.vmem (%p2382_p3), %s2705_s2, %s2054_s10  ;;  %s330_s23 = scalar_lea.vmem (%p2382_p3), [#allocation7], %s2009_s11 }
  0x1f   : > { %v380_v16 = vld [vmem:[%s337_s22] sm:$0xff] (%p2382_p3)  ;;  %v382_v17 = vld [vmem:[%s337_s22 + $0x8] sm:$0xff] (%p2382_p3) }
  0x20   : > { %v384_v18 = vld [vmem:[%s337_s22 + $0x20] sm:$0xff] (%p2382_p3)  ;;  %381 = vst [vmem:[%s330_s23] sm:$0xff] (%p2382_p3), %v380_v16  ;;  %383 = vst [vmem:[%s330_s23 + $0x8] sm:$0xff] (%p2382_p3), %v382_v17  ;;  %v386_v19 = vld [vmem:[%s337_s22 + $0x28] sm:$0xff] (%p2382_p3) }
  0x21   : > { %385 = vst [vmem:[%s330_s23 + $0x10] sm:$0xff] %v384_v18  ;;  %v388_v20 = vld [vmem:[%s337_s22 + $0x40] sm:$0xff]  ;;  %v390_v21 = vld [vmem:[%s337_s22 + $0x48] sm:$0xff]  ;;  %387 = vst [vmem:[%s330_s23 + $0x18] sm:$0xff] %v386_v19 }
  0x22   : > { %389 = vst [vmem:[%s330_s23 + $0x20] sm:$0xff] %v388_v20  ;;  %391 = vst [vmem:[%s330_s23 + $0x28] sm:$0xff] %v390_v21  ;;  %v392_v22 = vld [vmem:[%s337_s22 + $0x60] sm:$0xff]  ;;  %v394_v23 = vld [vmem:[%s337_s22 + $0x68] sm:$0xff] }
  0x23   : > { %393 = vst [vmem:[%s330_s23 + $0x30] sm:$0xff] %v392_v22  ;;  %395 = vst [vmem:[%s330_s23 + $0x38] sm:$0xff] %v394_v23 }
  0x24 PF: > { %p2012_p6 = scmp.ge.s32.totalorder %s2322_s16, 1  ;;  %p400_p7 = scmp.lt.s32.totalorder %s2322_s16, 3 }
  0x26   : > { %p401_p8 = pnand %p2012_p6, %p400_p7 }
  0x27   : > { %s407_s18 = sand.u32 (!%p401_p8), 1, %s2306_s12   ;;  %s2016_s27 = sshll.u32 (!%p401_p8), %s2314_s14, 1 }
  0x28   : > { %404 = sbr.rel (%p401_p8) target bundleno = 1023 (0x3ff), region = 134  ;;  %s2417_s24 = sshll.u32 (!%p401_p8), %s407_s18, 6 }
  0x29   : > { %s416_s25 = scalar_lea.vmem (!%p401_p8), [#allocation6], %s2417_s24  ;;  %s2423_s26 = scalar_lea.vmem (!%p401_p8), [#allocation5], %s2417_s24 }
  0x2a   : > { %s2595_s12 = scalar_lea.vmem (!%p401_p8), [#allocation7], %s2417_s24  ;;  %s2328_s28 = smov (!%p401_p8), 8  }
  0x2b   : > { %p467_p9 = scmp.lt.s32.totalorder (!%p401_p8), %s2016_s27, 3  ;;  %s2329_s14 = smov (!%p401_p8), 16  }
  0x2c   : > { %s2330_s6 = smov (!%p401_p8), 24  }
  0x2d   : > { %vm497_vm0 = vcmask 64512   ;;  %v515_v24 = vld [vmem:[%s416_s25 + $0x8] sm:$0xff]  ;;  %v517_v25 = vld [vmem:[%s416_s25 + $0x18] sm:$0xff]  ;;  %v514_v26 = vld [vmem:[%s416_s25] sm:$0xff]  ;;  %vm480_vm1 = vcmask 7168   ;;  %v2324_v40 = vmov -inf  }
  0x2e   : > { %2103 = vmatprep.subr.msk.mxu0 %vm497_vm0, %v515_v24  ;;  %2110 = vmatprep.subr.msk.mxu1 %vm497_vm0, %v517_v25  ;;  %v516_v27 = vld [vmem:[%s416_s25 + $0x10] sm:$0xff]  ;;  %v506_v28 = vld [vmem:[%s2423_s26] sm:$0xff]  ;;  %v519_v30 = vld [vmem:[%s416_s25 + $0x28] sm:$0xff]  ;;  %484 = vst.msk [vmem:[#allocation2 + $0x18] sm:$0xff] %vm480_vm1, %v2324_v40  ;;  %vm879_vm2 = vcmask 130048   ;;  %v2325_v57 = vmov 0  }
  0x2f   : > { %v508_v29 = vld [vmem:[%s2423_s26 + $0x10] sm:$0xff]  ;;  %2104 = vmatpush3.xpose.msk.msra.mxu0 %vm497_vm0, %v515_v24  ;;  %2111 = vmatpush3.xpose.msk.msra.mxu1 %vm497_vm0, %v517_v25  ;;  %v521_v31 = vld [vmem:[%s416_s25 + $0x38] sm:$0xff]  ;;  %v507_v32 = vld [vmem:[%s2423_s26 + $0x8] sm:$0xff]  ;;  %481 = vst.msk [vmem:[#allocation2] sm:$0xff] %vm480_vm1, %v2324_v40  ;;  %v2326_v58 = vmov 0.0   ;;  %s2715_s27 = smov (!%p467_p9, %s2016_s27), 3 }
  0x30   : > { %2105 = vmatprep.subr.msk.mxu0 %vm497_vm0, %v514_v26  ;;  %2112 = vmatprep.subr.msk.mxu1 %vm497_vm0, %v516_v27  ;;  %v509_v33 = vld [vmem:[%s2423_s26 + $0x18] sm:$0xff]  ;;  %v510_v34 = vld [vmem:[%s2423_s26 + $0x20] sm:$0xff]  ;;  %v520_v36 = vld [vmem:[%s416_s25 + $0x30] sm:$0xff]  ;;  %482 = vst.msk [vmem:[#allocation2 + $0x8] sm:$0xff] %vm480_vm1, %v2324_v40  ;;  %s2017_s29 = sshll.u32 %s2715_s27, 3  ;;  %vm1796_vm3 = vcmask 130112  }
  0x31   : > { %2107 = vmatprep.mubr.msk.f32.mxu0 %vm497_vm0, %v506_v28  ;;  %2114 = vmatprep.mubr.msk.f32.mxu1 %vm497_vm0, %v508_v29  ;;  %v518_v35 = vld [vmem:[%s416_s25 + $0x20] sm:$0xff]  ;;  %v512_v37 = vld [vmem:[%s2423_s26 + $0x30] sm:$0xff]  ;;  %v511_v38 = vld [vmem:[%s2423_s26 + $0x28] sm:$0xff]  ;;  %483 = vst.msk [vmem:[#allocation2 + $0x10] sm:$0xff] %vm480_vm1, %v2324_v40  ;;  %v2327_v29 = vmov 1.0   ;;  %s2673_s5 = scalar_lea.vmem %s2706_s3, %s2017_s29  ;;  %vm1827_vm4 = vcmask 195712  }
  0x32   : > { %v513_v39 = vld [vmem:[%s2423_s26 + $0x38] sm:$0xff]  ;;  %485 = vst.msk [vmem:[#allocation2 + $0x20] sm:$0xff] %vm480_vm1, %v2324_v40  ;;  %486 = vst.msk [vmem:[#allocation2 + $0x28] sm:$0xff] %vm480_vm1, %v2324_v40  ;;  %2234 = vset.pattern.permute.xlu0 %v2325_v57  ;;  %2235 = vset.pattern.permute.xlu1 %v2325_v57  ;;  %vm1858_vm5 = vcmask 261312  }
  0x33   : > { %2106 = vmatpush3.xpose.msk.msra.mxu0 %vm497_vm0, %v514_v26  ;;  %2113 = vmatpush3.xpose.msk.msra.mxu1 %vm497_vm0, %v516_v27  ;;  %487 = vst.msk [vmem:[#allocation2 + $0x30] sm:$0xff] %vm480_vm1, %v2324_v40  ;;  %488 = vst.msk [vmem:[#allocation2 + $0x38] sm:$0xff] %vm480_vm1, %v2324_v40 }
  0x34   : > { %2117 = vmatprep.subr.msk.mxu0 %vm497_vm0, %v519_v30  ;;  %2124 = vmatprep.subr.msk.mxu1 %vm497_vm0, %v521_v31  ;;  %501 = vst.msk [vmem:[#allocation4 + $0x18] sm:$0xff] %vm497_vm0, %v2326_v58  ;;  %498 = vst.msk [vmem:[#allocation4] sm:$0xff] %vm497_vm0, %v2326_v58 }
  0x35   : > { %489 = vst.msk [vmem:[#allocation3] sm:$0xff] %vm480_vm1, %v2326_v58  ;;  %490 = vst.msk [vmem:[#allocation3 + $0x8] sm:$0xff] %vm480_vm1, %v2326_v58  ;;  %v874_v59 = vld [vmem:[#allocation2 + $0x18] sm:$0xff] }
  0x36   : > { %2108 = vmatmul.mubr.msk.f32.vlgmr.msra.gmra.mxu0 %vm497_vm0, %v507_v32  ;;  %2115 = vmatmul.mubr.msk.f32.vlgmr.msra.gmra.mxu1 %vm497_vm0, %v509_v33  ;;  %491 = vst.msk [vmem:[#allocation3 + $0x10] sm:$0xff] %vm480_vm1, %v2326_v58  ;;  %492 = vst.msk [vmem:[#allocation3 + $0x18] sm:$0xff] %vm480_vm1, %v2326_v58  ;;  %v2516_v2 = vld [vmem:[#allocation2] sm:$0xff] }
  0x37   : > { %2118 = vmatpush3.xpose.msk.msra.mxu0 %vm497_vm0, %v519_v30  ;;  %2121 = vmatprep.mubr.msk.f32.mxu0 %vm497_vm0, %v510_v34  ;;  %493 = vst.msk [vmem:[#allocation3 + $0x20] sm:$0xff] %vm480_vm1, %v2326_v58  ;;  %494 = vst.msk [vmem:[#allocation3 + $0x28] sm:$0xff] %vm480_vm1, %v2326_v58  ;;  %v2511_v60 = vld [vmem:[#allocation2 + $0x8] sm:$0xff] }
  0x38   : > { %2119 = vmatprep.subr.msk.mxu0 %vm497_vm0, %v518_v35  ;;  %2125 = vmatpush3.xpose.msk.msra.mxu1 %vm497_vm0, %v521_v31  ;;  %495 = vst.msk [vmem:[#allocation3 + $0x30] sm:$0xff] %vm480_vm1, %v2326_v58  ;;  %496 = vst.msk [vmem:[#allocation3 + $0x38] sm:$0xff] %vm480_vm1, %v2326_v58  ;;  %v873_v1 = vld [vmem:[#allocation2 + $0x10] sm:$0xff] }
  0x39   : > { %2126 = vmatprep.subr.msk.mxu1 %vm497_vm0, %v520_v36  ;;  %2128 = vmatprep.mubr.msk.f32.mxu1 %vm497_vm0, %v512_v37  ;;  %499 = vst.msk [vmem:[#allocation4 + $0x8] sm:$0xff] %vm497_vm0, %v2326_v58  ;;  %500 = vst.msk [vmem:[#allocation4 + $0x10] sm:$0xff] %vm497_vm0, %v2326_v58  ;;  %v2527_v8 = vld [vmem:[#allocation2 + $0x28] sm:$0xff]  ;;  %v875_v11 = vld [vmem:[#allocation2 + $0x20] sm:$0xff] }
  0x3a   : > { %502 = vst.msk [vmem:[#allocation4 + $0x20] sm:$0xff] %vm497_vm0, %v2326_v58  ;;  %503 = vst.msk [vmem:[#allocation4 + $0x28] sm:$0xff] %vm497_vm0, %v2326_v58  ;;  %v2538_v15 = vld [vmem:[#allocation2 + $0x38] sm:$0xff]  ;;  %v2544_v19 = vld [vmem:[#allocation2 + $0x30] sm:$0xff] }
  0x3b   : > { %2120 = vmatpush3.xpose.msk.msra.mxu0 %vm497_vm0, %v518_v35  ;;  %504 = vst.msk [vmem:[#allocation4 + $0x30] sm:$0xff] %vm497_vm0, %v2326_v58  ;;  %505 = vst.msk [vmem:[#allocation4 + $0x38] sm:$0xff] %vm497_vm0, %v2326_v58 }
  0x3c   : > { %2127 = vmatpush3.xpose.msk.msra.mxu1 %vm497_vm0, %v520_v36  ;;  %2131 = vmatprep.subr.mxu0 %v2327_v29 }
  0x3d   : > { %2138 = vmatprep.subr.mxu1 %v2327_v29 }
  0x3e   : > { %2122 = vmatmul.mubr.msk.f32.vlgmr.msra.gmra.mxu0 %vm497_vm0, %v511_v38 }
  0x3f   : > { %2129 = vmatmul.mubr.msk.f32.vlgmr.msra.gmra.mxu1 %vm497_vm0, %v513_v39  ;;  %2132 = vmatpush3.msra.mxu0 %v2327_v29 }
  0x40   : > { %2133 = vmatprep.subr.mxu0 %v2327_v29  ;;  %2139 = vmatpush3.msra.mxu1 %v2327_v29 }
  0x41   : > { %2134 = vmatpush3.msra.mxu0 %v2327_v29  ;;  %2140 = vmatprep.subr.mxu1 %v2327_v29 }
  0x42   : > { %2141 = vmatpush3.msra.mxu1 %v2327_v29  ;;  %2145 = vmatprep.subr.mxu0 %v2327_v29 }
  0x43   : > { %2152 = vmatprep.subr.mxu1 %v2327_v29 }
  0xf6   : > { %v2463_v41 = vpop.f32.mrf.mxu0  ;;  %v2465_v42 = vpop.f32.mrf.mxu1 }
  0xf7   : > { %v889_v43 = vsel %vm879_vm2, %v2465_v42, -inf  ;;  %v883_v44 = vsel %vm879_vm2, %v2463_v41, -inf }
  0xf8   : > { %890 = vmax.xlane.f32.xlu1 %v889_v43  ;;  %884 = vmax.xlane.f32.xlu0 %v883_v44  ;;  %v2471_v45 = vpop.f32.mrf.mxu0  ;;  %v2473_v46 = vpop.f32.mrf.mxu1 }
  0xf9   : > { %v886_v47 = vsel %vm879_vm2, %v2473_v46, -inf  ;;  %v880_v48 = vsel %vm879_vm2, %v2471_v45, -inf }
  0xfc   : > { %887 = vmax.xlane.f32.xlu1 %v886_v47  ;;  %881 = vmax.xlane.f32.xlu0 %v880_v48 }
  0xfe   : > { %v2479_v49 = vpop.f32.mrf.mxu0 }
  0xff   : > { %v895_v50 = vsel %vm879_vm2, %v2479_v49, -inf  ;;  %v2483_v51 = vpop.f32.mrf.mxu1 }
 0x100   : > { %v2485_v52 = vpop.f32.mrf.mxu0  ;;  %896 = vmax.xlane.f32.xlu1 %v895_v50  ;;  %v901_v55 = vsel %vm879_vm2, %v2483_v51, -inf }
 0x101   : > { %v892_v53 = vsel %vm879_vm2, %v2485_v52, -inf  ;;  %v2489_v54 = vpop.f32.mrf.mxu1 }
 0x102   : > { %893 = vmax.xlane.f32.xlu0 %v892_v53  ;;  %v898_v56 = vsel %vm879_vm2, %v2489_v54, -inf }
 0x104   : > { %902 = vmax.xlane.f32.xlu1 %v901_v55 }
 0x106   : > { %899 = vmax.xlane.f32.xlu0 %v898_v56 }
 0x181   : > { %v891_v61 = vpop.xlane.xlu1 %890  ;;  %v885_v62 = vpop.xlane.xlu0 %884 }
 0x182   : > { %v907_v63 = vmax.f32 %v874_v59, %v891_v61  ;;  %v2514_v0 = vmax.f32 %v2511_v60, %v885_v62 }
 0x184   : > { %1740 = vst.msk [vmem:[#allocation2 + $0x18] sm:$0xff] %vm480_vm1, %v907_v63  ;;  %v913_v3 = vsub.f32 %v2511_v60, %v2514_v0  ;;  %1738 = vst.msk [vmem:[#allocation2 + $0x8] sm:$0xff] %vm480_vm1, %v2514_v0  ;;  %943 = vperm.xlu1 %2235, %v2514_v0   ;;  %v915_v12 = vsub.f32 %v874_v59, %v907_v63  ;;  %v1324_v0 = vld [vmem:[#allocation3] sm:$0xff] }
 0x185   : > { %v888_v4 = vpop.xlane.xlu1 %887  ;;  %v882_v5 = vpop.xlane.xlu0 %881 }
 0x186   : > { %v906_v6 = vmax.f32 %v873_v1, %v888_v4  ;;  %v2525_v7 = vmax.f32 %v2516_v2, %v882_v5  ;;  %v926_v20 = vmul.f32 1.442695, %v915_v12  ;;  %v1417_v12 = vld [vmem:[%s2595_s12 + $0x20] sm:$0xff] }
 0x188   : > { %1739 = vst.msk [vmem:[#allocation2 + $0x10] sm:$0xff] %vm480_vm1, %v906_v6  ;;  %v912_v9 = vsub.f32 %v2516_v2, %v2525_v7  ;;  %1737 = vst.msk [vmem:[#allocation2] sm:$0xff] %vm480_vm1, %v2525_v7  ;;  %953 = vperm.xlu1 %2235, %v907_v63   ;;  %938 = vperm.xlu0 %2234, %v2525_v7   ;;  %v914_v21 = vsub.f32 %v873_v1, %v906_v6  ;;  %2236 = vpow2.f32 %v926_v20  ;;  %v1419_v20 = vld [vmem:[%s2595_s12 + $0x30] sm:$0xff]  ;;  %v1327_v7 = vld [vmem:[#allocation3 + $0x18] sm:$0xff] }
 0x189   : > { %v897_v10 = vpop.xlane.xlu1 %896 }
 0x18a   : > { %v2536_v13 = vmax.f32 %v2527_v8, %v897_v10  ;;  %v924_v26 = vmul.f32 1.442695, %v914_v21  ;;  %v1418_v10 = vld [vmem:[%s2595_s12 + $0x28] sm:$0xff]  ;;  %v922_v21 = vmul.f32 1.442695, %v913_v3 }
 0x18b   : > { %v894_v14 = vpop.xlane.xlu0 %893 }
 0x18c   : > { %948 = vperm.xlu1 %2235, %v906_v6   ;;  %v917_v16 = vsub.f32 %v2527_v8, %v2536_v13  ;;  %1742 = vst.msk [vmem:[#allocation2 + $0x28] sm:$0xff] %vm480_vm1, %v2536_v13  ;;  %v908_v17 = vmax.f32 %v875_v11, %v894_v14  ;;  %2238 = vpow2.f32 %v924_v26  ;;  %v1413_v6 = vld [vmem:[%s2595_s12] sm:$0xff] }
 0x18d   : > { %v903_v18 = vpop.xlane.xlu1 %902 }
 0x18e   : > { %1741 = vst.msk [vmem:[#allocation2 + $0x20] sm:$0xff] %vm480_vm1, %v908_v17  ;;  %v2548_v22 = vmax.f32 %v2538_v15, %v903_v18  ;;  %v916_v27 = vsub.f32 %v875_v11, %v908_v17  ;;  %v1420_v18 = vld [vmem:[%s2595_s12 + $0x38] sm:$0xff]  ;;  %v930_v26 = vmul.f32 1.442695, %v917_v16  ;;  %v1326_v16 = vld [vmem:[#allocation3 + $0x10] sm:$0xff] }
 0x18f   : > { %v900_v23 = vpop.xlane.xlu0 %899 }
 0x190   : > { %963 = vperm.xlu1 %2235, %v2536_v13   ;;  %v919_v24 = vsub.f32 %v2538_v15, %v2548_v22  ;;  %1744 = vst.msk [vmem:[#allocation2 + $0x38] sm:$0xff] %vm480_vm1, %v2548_v22  ;;  %v2556_v25 = vmax.f32 %v2544_v19, %v900_v23  ;;  %v928_v30 = vmul.f32 1.442695, %v916_v27  ;;  %v920_v23 = vmul.f32 1.442695, %v912_v9 }
 0x192   : > { %v918_v28 = vsub.f32 %v2544_v19, %v2556_v25  ;;  %1743 = vst.msk [vmem:[#allocation2 + $0x30] sm:$0xff] %vm480_vm1, %v2556_v25  ;;  %2240 = vpow2.f32 %v928_v30  ;;  %v934_v30 = vmul.f32 1.442695, %v919_v24 }
 0x194   : > { %958 = vperm.xlu1 %2235, %v908_v17   ;;  %v1415_v17 = vld [vmem:[%s2595_s12 + $0x10] sm:$0xff]  ;;  %v932_v2 = vmul.f32 1.442695, %v918_v28 }
 0x195   : > { %v2574_v31 = vpop.eup %2236 }
 0x196   : > { %v1335_v15 = vmul.f32 %v2574_v31, %v1327_v7 }
 0x198   : > { %968 = vperm.xlu1 %2235, %v2556_v25  }
 0x199   : > { %v2577_v32 = vpop.eup %2238 }
 0x19a   : > { %v1334_v19 = vmul.f32 %v2577_v32, %v1326_v16 }
 0x19c   : > { %973 = vperm.xlu1 %2235, %v2548_v22  }
 0x19f   : > { %v2580_v33 = vpop.eup %2240 }
 0x1a0   : > { %1382 = vperm.xlu1 %2235, %v2574_v31   ;;  %v1328_v31 = vld [vmem:[#allocation3 + $0x20] sm:$0xff] }
 0x1a4   : > { %1377 = vperm.xlu1 %2235, %v2577_v32  }
 0x1a8   : > { %1387 = vperm.xlu1 %2235, %v2580_v33  }
 0x1ff   : > { %v944_v34 = vpop.permute.xlu1 %943 }
 0x200   : > { %v977_v35 = vsub.f32 %v2463_v41, %v944_v34 }
 0x202   : > { %v986_v40 = vmul.f32 1.442695, %v977_v35 }
 0x203   : > { %v954_v36 = vpop.permute.xlu1 %953  ;;  %v939_v37 = vpop.permute.xlu0 %938 }
 0x204   : > { %v976_v38 = vsub.f32 %v2471_v45, %v939_v37  ;;  %v979_v39 = vsub.f32 %v2465_v42, %v954_v36 }
 0x206   : > { %v984_v43 = vmul.f32 1.442695, %v976_v38  ;;  %v990_v48 = vmul.f32 1.442695, %v979_v39  ;;  %v1329_v38 = vld [vmem:[#allocation3 + $0x28] sm:$0xff] }
 0x207   : > { %v949_v44 = vpop.permute.xlu1 %948 }
 0x208   : > { %v978_v47 = vsub.f32 %v2473_v46, %v949_v44  ;;  %2242 = vpow2.f32 %v984_v43 }
 0x209   : > { %2244 = vpow2.f32 %v986_v40 }
 0x20a   : > { %v988_v50 = vmul.f32 1.442695, %v978_v47  ;;  %v1336_v47 = vmul.f32 %v2580_v33, %v1328_v31  ;;  %v1360_v33 = vld [vmem:[#allocation4 + $0x18] sm:$0xff] }
 0x20b   : > { %v964_v53 = vpop.permute.xlu1 %963 }
 0x20c   : > { %2246 = vpow2.f32 %v988_v50  ;;  %v981_v41 = vsub.f32 %v2479_v49, %v964_v53 }
 0x20d   : > { %2248 = vpow2.f32 %v990_v48 }
 0x20e   : > { %v994_v45 = vmul.f32 1.442695, %v981_v41  ;;  %v1331_v41 = vld [vmem:[#allocation3 + $0x38] sm:$0xff] }
 0x20f   : > { %v959_v55 = vpop.permute.xlu1 %958 }
 0x210   : > { %v980_v56 = vsub.f32 %v2485_v52, %v959_v55 }
 0x212   : > { %v992_v42 = vmul.f32 1.442695, %v980_v56 }
 0x213   : > { %v969_v57 = vpop.permute.xlu1 %968 }
 0x214   : > { %2250 = vpow2.f32 %v992_v42  ;;  %v982_v58 = vsub.f32 %v2489_v54, %v969_v57  ;;  %v1414_v54 = vld [vmem:[%s2595_s12 + $0x8] sm:$0xff]  ;;  %v1330_v42 = vld [vmem:[#allocation3 + $0x30] sm:$0xff] }
 0x215   : > { %2252 = vpow2.f32 %v994_v45  ;;  %v2243_v46 = vpop.eup %2242 }
 0x216   : > { %v996_v59 = vmul.f32 1.442695, %v982_v58  ;;  %v2245_v61 = vpop.eup %2244  ;;  %2135 = vmatprep.mubr.msk.f32.mxu0 %vm879_vm2, %v2243_v46 }
 0x217   : > { %v974_v62 = vpop.permute.xlu1 %973  ;;  %2136 = vmatmul.mubr.msk.f32.vlgmr.msra.gmra.mxu0 %vm879_vm2, %v2245_v61 }
 0x218   : > { %2254 = vpow2.f32 %v996_v59  ;;  %v983_v49 = vsub.f32 %v2483_v51, %v974_v62  ;;  %2146 = vmatpush3.msra.mxu0 %v2327_v29  ;;  %v1416_v51 = vld [vmem:[%s2595_s12 + $0x18] sm:$0xff] }
 0x219   : > { %v2247_v52 = vpop.eup %2246  ;;  %2147 = vmatprep.subr.mxu0 %v2327_v29 }
 0x21a   : > { %v2249_v63 = vpop.eup %2248  ;;  %v998_v1 = vmul.f32 1.442695, %v983_v49  ;;  %2142 = vmatprep.mubr.msk.f32.mxu1 %vm879_vm2, %v2247_v52  ;;  %2148 = vmatpush3.msra.mxu0 %v2327_v29 }
 0x21b   : > { %2143 = vmatmul.mubr.msk.f32.vlgmr.msra.gmra.mxu1 %vm879_vm2, %v2249_v63  ;;  %2159 = vmatprep.subr.mxu0 %v1414_v54  ;;  %v1383_v28 = vpop.permute.xlu1 %1382 }
 0x21c   : > { %2256 = vpow2.f32 %v998_v1  ;;  %2153 = vmatpush3.msra.mxu1 %v2327_v29  ;;  %v1408_v1 = vmul.f32 %v1383_v28, %v1360_v33 }
 0x21d   : > { %2154 = vmatprep.subr.mxu1 %v2327_v29  ;;  %2258 = vpow2.f32 %v922_v21 }
 0x21e   : > { %2155 = vmatpush3.msra.mxu1 %v2327_v29  ;;  %2260 = vpow2.f32 %v920_v23  ;;  %v1325_v29 = vld [vmem:[#allocation3 + $0x8] sm:$0xff] }
 0x21f   : > { %2166 = vmatprep.subr.mxu1 %v1416_v51  ;;  %2262 = vpow2.f32 %v930_v26  ;;  %v1378_v43 = vpop.permute.xlu1 %1377 }
 0x220   : > { %2264 = vpow2.f32 %v934_v30 }
 0x221   : > { %v2251_v4 = vpop.eup %2250  ;;  %2266 = vpow2.f32 %v932_v2  ;;  %v1362_v2 = vld [vmem:[#allocation4 + $0x28] sm:$0xff] }
 0x222   : > { %v2253_v5 = vpop.eup %2252  ;;  %2149 = vmatprep.mubr.msk.f32.mxu0 %vm879_vm2, %v2251_v4 }
 0x223   : > { %2150 = vmatmul.mubr.msk.f32.vlgmr.msra.gmra.mxu0 %vm879_vm2, %v2253_v5  ;;  %v1388_v59 = vpop.permute.xlu1 %1387 }
 0x224   : > { %2160 = vmatpush3.msra.mxu0 %v1414_v54  ;;  %2163 = vmatprep.mubr.msk.f32.mxu0 %vm879_vm2, %v2243_v46  ;;  %v1361_v46 = vld [vmem:[#allocation4 + $0x20] sm:$0xff] }
 0x225   : > { %v2255_v11 = vpop.eup %2254  ;;  %2161 = vmatprep.subr.mxu0 %v1413_v6 }
 0x226   : > { %2156 = vmatprep.mubr.msk.f32.mxu1 %vm879_vm2, %v2255_v11  ;;  %2162 = vmatpush3.msra.mxu0 %v1413_v6 }
 0x227   : > { %2164 = vmatmul.mubr.msk.f32.vlgmr.msra.gmra.mxu0 %vm879_vm2, %v2245_v61  ;;  %2173 = vmatprep.subr.mxu0 %v1418_v10 }
 0x228   : > { %2174 = vmatpush3.msra.mxu0 %v1418_v10  ;;  %2177 = vmatprep.mubr.msk.f32.mxu0 %vm879_vm2, %v2251_v4 }
 0x229   : > { %v2257_v14 = vpop.eup %2256  ;;  %2175 = vmatprep.subr.mxu0 %v1417_v12 }
 0x22a   : > { %2157 = vmatmul.mubr.msk.f32.vlgmr.msra.gmra.mxu1 %vm879_vm2, %v2257_v14  ;;  %2176 = vmatpush3.msra.mxu0 %v1417_v12  ;;  %v2633_v27 = vpop.eup %2258 }
 0x22b   : > { %2167 = vmatpush3.msra.mxu1 %v1416_v51  ;;  %2170 = vmatprep.mubr.msk.f32.mxu1 %vm879_vm2, %v2247_v52  ;;  %v2638_v60 = vpop.eup %2260  ;;  %v1333_v3 = vmul.f32 %v2633_v27, %v1325_v29  ;;  %v1359_v52 = vld [vmem:[#allocation4 + $0x10] sm:$0xff]  ;;  %v1409_v51 = vmul.f32 %v1388_v59, %v1361_v46  ;;  %v1358_v46 = vld [vmem:[#allocation4 + $0x8] sm:$0xff] }
 0x22c   : > { %2178 = vmatmul.mubr.msk.f32.vlgmr.msra.gmra.mxu0 %vm879_vm2, %v2253_v5  ;;  %2168 = vmatprep.subr.mxu1 %v1415_v17  ;;  %v1332_v13 = vmul.f32 %v2638_v60, %v1324_v0  ;;  %v2263_v37 = vpop.eup %2262 }
 0x22d   : > { %2169 = vmatpush3.msra.mxu1 %v1415_v17  ;;  %v1337_v39 = vmul.f32 %v2263_v37, %v1329_v38  ;;  %v2265_v50 = vpop.eup %2264 }
 0x22e   : > { %2171 = vmatmul.mubr.msk.f32.vlgmr.msra.gmra.mxu1 %vm879_vm2, %v2249_v63  ;;  %2180 = vmatprep.subr.mxu1 %v1420_v18  ;;  %v2267_v45 = vpop.eup %2266  ;;  %v1339_v58 = vmul.f32 %v2265_v50, %v1331_v41 }
 0x22f   : > { %2181 = vmatpush3.msra.mxu1 %v1420_v18  ;;  %2184 = vmatprep.mubr.msk.f32.mxu1 %vm879_vm2, %v2255_v11  ;;  %v1338_v49 = vmul.f32 %v2267_v45, %v1330_v42  ;;  %v1407_v11 = vmul.f32 %v1378_v43, %v1359_v52 }
 0x230   : > { %2182 = vmatprep.subr.mxu1 %v1419_v20 }
 0x231   : > { %2183 = vmatpush3.msra.mxu1 %v1419_v20 }
 0x232   : > { %2185 = vmatmul.mubr.msk.f32.vlgmr.msra.gmra.mxu1 %vm879_vm2, %v2257_v14 }
 0x2d7   : > { %v2137_v8 = vpop.f32.mrf.mxu0 }
 0x2d8   : > { %v1341_v9 = vadd.f32 %v2137_v8, %v1333_v3 }
 0x2d9   : > { %v1072_v34 = vpop.f32.mrf.mxu0 }
 0x2da   : > { %1350 = vst.msk [vmem:[#allocation3 + $0x8] sm:$0xff] %vm480_vm1, %v1341_v9  ;;  %v1340_v22 = vadd.f32 %v1332_v13, %v1072_v34  ;;  %v1363_v13 = vld [vmem:[#allocation4 + $0x30] sm:$0xff] }
 0x2db   : > { %v2144_v24 = vpop.f32.mrf.mxu1 }
 0x2dc   : > { %v1343_v35 = vadd.f32 %v2144_v24, %v1335_v15  ;;  %1349 = vst.msk [vmem:[#allocation3] sm:$0xff] %vm480_vm1, %v1340_v22 }
 0x2dd   : > { %v1153_v25 = vpop.f32.mrf.mxu1 }
 0x2de   : > { %1352 = vst.msk [vmem:[#allocation3 + $0x18] sm:$0xff] %vm480_vm1, %v1343_v35  ;;  %v1342_v36 = vadd.f32 %v1334_v19, %v1153_v25 }
 0x2e0   : > { %1351 = vst.msk [vmem:[#allocation3 + $0x10] sm:$0xff] %vm480_vm1, %v1342_v36  ;;  %v1357_v36 = vld [vmem:[#allocation4] sm:$0xff] }
 0x2e1   : > { %v1751_v29 = vld [vmem:[#allocation3 + $0x8] sm:$0xff] }
 0x2e3   : > { %v2151_v40 = vpop.f32.mrf.mxu0  ;;  %v1750_v20 = vld [vmem:[#allocation3] sm:$0xff] }
 0x2e4   : > { %v1345_v44 = vadd.f32 %v2151_v40, %v1337_v39 }
 0x2e5   : > { %v1234_v48 = vpop.f32.mrf.mxu0  ;;  %v1773_v32 = vld [vmem:[#allocation3 + $0x18] sm:$0xff] }
 0x2e6   : > { %1354 = vst.msk [vmem:[#allocation3 + $0x28] sm:$0xff] %vm480_vm1, %v1345_v44  ;;  %v1344_v53 = vadd.f32 %v1336_v47, %v1234_v48  ;;  %1781 = vperm.xlu0 %2234, %v1773_v32  }
 0x2e7   : > { %v2653_v55 = vpop.f32.mrf.mxu0  ;;  %v1772_v56 = vld [vmem:[#allocation3 + $0x10] sm:$0xff] }
 0x2e8   : > { %1353 = vst.msk [vmem:[#allocation3 + $0x20] sm:$0xff] %vm480_vm1, %v1344_v53  ;;  %1776 = vperm.xlu1 %2235, %v1772_v56  }
 0x2e9   : > { %v2656_v57 = vpop.f32.mrf.mxu0 }
 0x2ea   : > { %v2158_v61 = vpop.f32.mrf.mxu1 }
 0x2eb   : > { %v1347_v62 = vadd.f32 %v2158_v61, %v1339_v58 }
 0x2ec   : > { %v2179_v54 = vpop.f32.mrf.mxu0  ;;  %1392 = vperm.xlu1 %2235, %v2263_v37   ;;  %v1315_v63 = vpop.f32.mrf.mxu1 }
 0x2ed   : > { %1356 = vst.msk [vmem:[#allocation3 + $0x38] sm:$0xff] %vm480_vm1, %v1347_v62  ;;  %v1346_v4 = vadd.f32 %v1338_v49, %v1315_v63  ;;  %v1804_v5 = vld [vmem:[#allocation3 + $0x28] sm:$0xff] }
 0x2ee   : > { %v1637_v6 = vpop.f32.mrf.mxu0  ;;  %v2172_v10 = vpop.f32.mrf.mxu1  ;;  %1812 = vperm.xlu0 %2234, %v1804_v5  }
 0x2ef   : > { %1355 = vst.msk [vmem:[#allocation3 + $0x30] sm:$0xff] %vm480_vm1, %v1346_v4  ;;  %v1725_v12 = vadd.f32 %v1637_v6, %v1409_v51  ;;  %v1724_v14 = vadd.f32 %v2172_v10, %v1408_v1  ;;  %v1803_v23 = vld [vmem:[#allocation3 + $0x20] sm:$0xff] }
 0x2f0   : > { %v1562_v17 = vpop.f32.mrf.mxu1  ;;  %1397 = vperm.xlu1 %2235, %v2267_v45  }
 0x2f1   : > { %1733 = vst.msk [vmem:[#allocation4 + $0x20] sm:$0xff] %vm497_vm0, %v1725_v12  ;;  %1732 = vst.msk [vmem:[#allocation4 + $0x18] sm:$0xff] %vm497_vm0, %v1724_v14  ;;  %v1723_v18 = vadd.f32 %v1562_v17, %v1407_v11 }
 0x2f2   : > { %v2186_v8 = vpop.f32.mrf.mxu1 }
 0x2f3   : > { %1731 = vst.msk [vmem:[#allocation4 + $0x10] sm:$0xff] %vm497_vm0, %v1723_v18 }
 0x2f4   : > { %1754 = vperm.xlu1 %2235, %v1750_v20   ;;  %v1835_v21 = vld [vmem:[#allocation3 + $0x38] sm:$0xff]  ;;  %v1712_v15 = vpop.f32.mrf.mxu1 }
 0x2f5   : > { %1843 = vperm.xlu0 %2234, %v1835_v21  }
 0x2f6   : > { %v1834_v26 = vld [vmem:[#allocation3 + $0x30] sm:$0xff] }
 0x2f8   : > { %1367 = vperm.xlu1 %2235, %v2638_v60   ;;  %v1770_v35 = vld [vmem:[#allocation4 + $0x18] sm:$0xff]  ;;  %v1800_v59 = vld [vmem:[#allocation4 + $0x20] sm:$0xff] }
 0x2f9   : > { %1807 = vperm.xlu0 %2234, %v1803_v23  }
 0x2fa   : > { %v1769_v37 = vld [vmem:[#allocation4 + $0x10] sm:$0xff] }
 0x2fd   : > { %1838 = vperm.xlu0 %2234, %v1834_v26  }
 0x301   : > { %1402 = vperm.xlu0 %2234, %v2265_v50   ;;  %v1364_v50 = vld [vmem:[#allocation4 + $0x38] sm:$0xff] }
 0x305   : > { %1759 = vperm.xlu0 %2234, %v1751_v29  }
 0x309   : > { %1372 = vperm.xlu0 %2234, %v2633_v27  }
 0x361   : > { %v1782_v30 = vpop.permute.xlu0 %1781 }
 0x362   : > { %2268 = vrcp.f32 %v1782_v30 }
 0x363   : > { %v1777_v0 = vpop.permute.xlu1 %1776 }
 0x364   : > { %2270 = vrcp.f32 %v1777_v0 }
 0x367   : > { %v1393_v3 = vpop.permute.xlu1 %1392 }
 0x368   : > { %v1410_v7 = vmul.f32 %v1393_v3, %v1362_v2 }
 0x369   : > { %v1813_v9 = vpop.permute.xlu0 %1812 }
 0x36a   : > { %v1726_v60 = vadd.f32 %v2179_v54, %v1410_v7  ;;  %2272 = vrcp.f32 %v1813_v9 }
 0x36b   : > { %v1398_v16 = vpop.permute.xlu1 %1397 }
 0x36c   : > { %1734 = vst.msk [vmem:[#allocation4 + $0x28] sm:$0xff] %vm497_vm0, %v1726_v60  ;;  %v1411_v34 = vmul.f32 %v1398_v16, %v1363_v13 }
 0x36e   : > { %v1727_v22 = vadd.f32 %v1712_v15, %v1411_v34 }
 0x36f   : > { %v2269_v27 = vpop.eup %2268  ;;  %v1755_v24 = vpop.permute.xlu1 %1754 }
 0x370   : > { %1735 = vst.msk [vmem:[#allocation4 + $0x30] sm:$0xff] %vm497_vm0, %v1727_v22  ;;  %v1844_v19 = vpop.permute.xlu0 %1843  ;;  %v1787_v25 = vmul.f32 %v2269_v27, %v1770_v35  ;;  %2274 = vrcp.f32 %v1755_v24 }
 0x371   : > { %v2271_v28 = vpop.eup %2270 }
 0x372   : > { %1792 = vrot.lane.b32.xlu0 %v1787_v25, %s2328_s28  ;;  %v1785_v38 = vmul.f32 %v2271_v28, %v1769_v37 }
 0x373   : > { %v1368_v31 = vpop.permute.xlu1 %1367  ;;  %v1801_v47 = vld [vmem:[#allocation4 + $0x28] sm:$0xff] }
 0x374   : > { %v1405_v39 = vmul.f32 %v1368_v31, %v1357_v36  ;;  %1790 = vrot.lane.b32.xlu1 %v1785_v38, %s2328_s28  ;;  %v1808_v40 = vpop.permute.xlu0 %1807 }
 0x375   : > { %2276 = vrcp.f32 %v1808_v40 }
 0x376   : > { %v1721_v43 = vadd.f32 %v2656_v57, %v1405_v39 }
 0x377   : > { %v2273_v44 = vpop.eup %2272  ;;  %v1831_v54 = vld [vmem:[#allocation4 + $0x30] sm:$0xff] }
 0x378   : > { %1729 = vst.msk [vmem:[#allocation4] sm:$0xff] %vm497_vm0, %v1721_v43  ;;  %v1839_v48 = vpop.permute.xlu0 %1838  ;;  %v1818_v32 = vmul.f32 %v2273_v44, %v1801_v47 }
 0x379   : > { %2278 = vrcp.f32 %v1839_v48 }
 0x37a   : > { %1823 = vrot.lane.b32.xlu0 %v1818_v32, %s2329_s14  ;;  %2280 = vrcp.f32 %v1844_v19 }
 0x37c   : > { %v1403_v53 = vpop.permute.xlu0 %1402 }
 0x37d   : > { %v1412_v41 = vmul.f32 %v1403_v53, %v1364_v50  ;;  %v2275_v56 = vpop.eup %2274 }
 0x37f   : > { %v1728_v45 = vadd.f32 %v2186_v8, %v1412_v41  ;;  %v1748_v42 = vld [vmem:[#allocation4] sm:$0xff] }
 0x380   : > { %v1760_v57 = vpop.permute.xlu0 %1759  ;;  %v1763_v58 = vmul.f32 %v2275_v56, %v1748_v42 }
 0x381   : > { %1736 = vst.msk [vmem:[#allocation4 + $0x38] sm:$0xff] %vm497_vm0, %v1728_v45  ;;  %2282 = vrcp.f32 %v1760_v57 }
 0x382   : > { %v2277_v33 = vpop.eup %2276  ;;  %1766 = vst.msk [vmem:[%s2673_s5] sm:$0xff] %vm497_vm0, %v1763_v58 }
 0x383   : > { %v1816_v61 = vmul.f32 %v2277_v33, %v1800_v59 }
 0x384   : > { %v1373_v62 = vpop.permute.xlu0 %1372 }
 0x385   : > { %v1406_v49 = vmul.f32 %v1373_v62, %v1358_v46  ;;  %1821 = vrot.lane.b32.xlu1 %v1816_v61, %s2329_s14 }
 0x386   : > { %v2279_v52 = vpop.eup %2278 }
 0x387   : > { %v1722_v63 = vadd.f32 %v2653_v55, %v1406_v49  ;;  %v1847_v1 = vmul.f32 %v2279_v52, %v1831_v54  ;;  %v2281_v51 = vpop.eup %2280 }
 0x388   : > { %v1832_v4 = vld [vmem:[#allocation4 + $0x38] sm:$0xff] }
 0x389   : > { %1730 = vst.msk [vmem:[#allocation4 + $0x8] sm:$0xff] %vm497_vm0, %v1722_v63  ;;  %1852 = vrot.lane.b32.xlu1 %v1847_v1, %s2330_s6  ;;  %v1849_v5 = vmul.f32 %v2281_v51, %v1832_v4 }
 0x38b   : > { %1854 = vrot.lane.b32.xlu0 %v1849_v5, %s2330_s6 }
 0x38e   : > { %v2283_v6 = vpop.eup %2282 }
 0x390   : > { %v1749_v10 = vld [vmem:[#allocation4 + $0x8] sm:$0xff] }
 0x391   : > { %v1765_v11 = vmul.f32 %v2283_v6, %v1749_v10 }
 0x393   : > { %1767 = vst.msk [vmem:[%s2673_s5 + $0x8] sm:$0xff] %vm497_vm0, %v1765_v11 }
 0x3e4   : > { %v1793_v12 = vpop.permute.xlu0 %1792 }
 0x3e5   : > { %1798 = vst.msk [vmem:[%s2673_s5 + $0x8] sm:$0xff] %vm1796_vm3, %v1793_v12 }
 0x3e6   : > { %v1791_v55 = vpop.permute.xlu1 %1790 }
 0x3e7   : > { %1797 = vst.msk [vmem:[%s2673_s5] sm:$0xff] %vm1796_vm3, %v1791_v55 }
 0x3ec   : > { %v1824_v17 = vpop.permute.xlu0 %1823 }
 0x3ed   : > { %1829 = vst.msk [vmem:[%s2673_s5 + $0x8] sm:$0xff] %vm1827_vm4, %v1824_v17 }
 0x3f7   : > { %v1822_v14 = vpop.permute.xlu1 %1821 }
 0x3f8   : > { %1828 = vst.msk [vmem:[%s2673_s5] sm:$0xff] %vm1827_vm4, %v1822_v14 }
 0x3fb   : > { %v1853_v18 = vpop.permute.xlu1 %1852 }
 0x3fc   : > { %1859 = vst.msk [vmem:[%s2673_s5] sm:$0xff] %vm1858_vm5, %v1853_v18 }
 0x3fd   : > { %v1855_v20 = vpop.permute.xlu0 %1854 }
 0x3fe   : > { %1860 = vst.msk [vmem:[%s2673_s5 + $0x8] sm:$0xff] %vm1858_vm5, %v1855_v20 }
 0x3ff PF: > { %s13_s16 = sadd.s32 1, %s2322_s16   ;;  %s2708_s12 = smov %s2310_s13 }
 0x400   : > { %p10_p10 = scmp.ge.s32.totalorder %s13_s16, 4   ;;  %s2709_s13 = smov %s2390_s21 }
 0x401   : > { %s2710_s14 = smov %s2318_s15  ;;  %s2711_s15 = smov %s2713_s17 }
 0x402   :  { %12 = sbr.rel (!%p10_p10) target bundleno = 3 (0x3), region = 211 }

</bundles_post_ra>
